<compile_context>
chip_gen: v7x
topology: tpu7x:2x2x1
jax: 0.10.0
libtpu: 0.0.40
codegen_flags: <defaults>
</compile_context>

<pallas_src>
import functools
import math

import jax
import jax.numpy as jnp
from jax.experimental import pallas as pl
from jax.experimental.pallas import tpu as pltpu


_VMEM_LIMIT = 32 * 1024 * 1024  # fits bf16 tiles comfortably on v5e/v6e/v7x


# ----------------------------- Pallas kernels -----------------------------

def _gelu(y):
    # TODO(synk): HF bert-base-cased uses exact erf GELU; tanh approximation used here.
    c = jnp.float32(math.sqrt(2.0 / math.pi))
    return 0.5 * y * (1.0 + jnp.tanh(c * (y + 0.044715 * y * y * y)))


def _dense_kernel(x_ref, w_ref, b_ref, o_ref, *, activation):
    # bf16 x bf16 matmul, f32 accumulate; bias / activation in f32.
    y = jnp.dot(x_ref[...], w_ref[...], preferred_element_type=jnp.float32)
    y = y + b_ref[...]
    if activation == "gelu":
        y = _gelu(y)
    elif activation == "tanh":
        y = jnp.tanh(y)
    o_ref[...] = y.astype(o_ref.dtype)


def _dense_add_ln_kernel(x_ref, w_ref, b_ref, res_ref, g_ref, beta_ref, o_ref, *, eps):
    """LayerNorm((x @ w + b) + res) * gamma + beta, fused. Stats in f32."""
    h = jnp.dot(x_ref[...], w_ref[...], preferred_element_type=jnp.float32)
    h = h + b_ref[...] + res_ref[...].astype(jnp.float32)
    mean = jnp.mean(h, axis=-1, keepdims=True)
    var = jnp.mean((h - mean) * (h - mean), axis=-1, keepdims=True)
    normed = (h - mean) * jax.lax.rsqrt(var + eps)
    o_ref[...] = (normed * g_ref[...] + beta_ref[...]).astype(o_ref.dtype)


def _ln_kernel(x_ref, g_ref, b_ref, o_ref, *, eps):
    h = x_ref[...].astype(jnp.float32)
    mean = jnp.mean(h, axis=-1, keepdims=True)
    var = jnp.mean((h - mean) * (h - mean), axis=-1, keepdims=True)
    normed = (h - mean) * jax.lax.rsqrt(var + eps)
    o_ref[...] = (normed * g_ref[...] + b_ref[...]).astype(o_ref.dtype)


def _attention_kernel(qkv_ref, mask_ref, o_ref, *, n_heads, dh):
    """Scaled dot-product attention on the fused [S, 3H] QKV slab.

    Grid is (batch, query_tile); the full slab stays resident across query tiles.
    The 1/sqrt(dh) scale is pre-folded into the Q projection weights.
    Softmax statistics in f32; MXU operands bf16; heads processed in pairs so every
    output store is a lane-dense 2*dh-wide slice and live ranges stay bounded.
    """
    S = qkv_ref.shape[1]
    tq = o_ref.shape[1]
    H = n_heads * dh
    qi = pl.program_id(1)
    q0 = pl.multiple_of(qi * tq, tq)
    mask = mask_ref[0].astype(jnp.float32)                      # (1, S) additive mask

    h = 0
    while h < n_heads:                                          # static python loop
        nh = 2 if h + 1 < n_heads else 1
        ctx = []
        for hh in range(h, h + nh):
            q = qkv_ref[0, pl.ds(q0, tq), pl.ds(hh * dh, dh)]               # (tq, dh) bf16
            k = qkv_ref[0, :, pl.ds(H + hh * dh, dh)]                        # (S, dh)  bf16
            v = qkv_ref[0, :, pl.ds(2 * H + hh * dh, dh)]                    # (S, dh)  bf16
            # contract last dims of q and k: no explicit transpose on the K tile
            s = jax.lax.dot_general(q, k, (((1,), (1,)), ((), ())),
                                    preferred_element_type=jnp.float32)      # (tq, S) f32
            s = s + mask
            s = s - jnp.max(s, axis=-1, keepdims=True)
            p = jnp.exp(s)
            p = p * pl.reciprocal(jnp.sum(p, axis=-1, keepdims=True), approx=True)
            ctx.append(jnp.dot(p.astype(v.dtype), v,
                               preferred_element_type=jnp.float32))           # (tq, dh) f32
        out = ctx[0] if nh == 1 else jnp.concatenate(ctx, axis=-1)
        o_ref[0, :, pl.ds(h * dh, nh * dh)] = out.astype(o_ref.dtype)
        h += nh


def _pool_head_kernel(cls_ref, wp_ref, bp_ref, wo_ref, bo_ref, o_ref):
    """logits = tanh(cls @ Wp + bp) @ Wo + bo  (BERT pooler + classifier head fused).
       nn.Dropout(p=0.3) between them is identity in eval mode."""
    pooled = jnp.tanh(
        jnp.dot(cls_ref[...], wp_ref[...], preferred_element_type=jnp.float32) + bp_ref[...])
    o_ref[...] = (jnp.dot(pooled.astype(wo_ref.dtype), wo_ref[...],
                          preferred_element_type=jnp.float32) + bo_ref[...]).astype(o_ref.dtype)


# ----------------------------- wrappers -----------------------------

def _pick_row_tile(M):
    """Whole problem if small; otherwise the largest row tile up to 512 (multiple of 8)."""
    if M <= 512:
        return M
    for t in (512, 256, 128, 64, 32, 16, 8):
        if M % t == 0:
            return t
    return M


def _pick_seq_tile(S):
    if S <= 256:
        return S
    for t in (256, 128, 64, 32, 16, 8):
        if S % t == 0:
            return t
    return S


def dense(x, w, b, activation="none", out_dtype=jnp.bfloat16):
    M, K = x.shape
    _, N = w.shape
    tm = _pick_row_tile(M)
    return pl.pallas_call(
        functools.partial(_dense_kernel, activation=activation),
        out_shape=jax.ShapeDtypeStruct((M, N), out_dtype),
        grid=(M // tm,),
        in_specs=[
            pl.BlockSpec((tm, K), lambda i: (i, 0)),
            # grid-invariant operands: single-buffered (no pointless duplicate in VMEM)
            pl.BlockSpec((K, N), lambda i: (0, 0), pipeline_mode=pl.Buffered(1)),
            pl.BlockSpec((1, N), lambda i: (0, 0), pipeline_mode=pl.Buffered(1)),
        ],
        out_specs=pl.BlockSpec((tm, N), lambda i: (i, 0)),
        compiler_params=pltpu.CompilerParams(
            dimension_semantics=("parallel",), vmem_limit_bytes=_VMEM_LIMIT),
    )(x, w, b.reshape(1, N))


def dense_add_layernorm(x, w, b, res, gamma, beta, eps=1e-12, out_dtype=jnp.bfloat16):
    M, K = x.shape
    _, N = w.shape
    tm = _pick_row_tile(M)
    return pl.pallas_call(
        functools.partial(_dense_add_ln_kernel, eps=eps),
        out_shape=jax.ShapeDtypeStruct((M, N), out_dtype),
        grid=(M // tm,),
        in_specs=[
            pl.BlockSpec((tm, K), lambda i: (i, 0)),
            pl.BlockSpec((K, N), lambda i: (0, 0), pipeline_mode=pl.Buffered(1)),
            pl.BlockSpec((1, N), lambda i: (0, 0), pipeline_mode=pl.Buffered(1)),
            pl.BlockSpec((tm, N), lambda i: (i, 0)),
            pl.BlockSpec((1, N), lambda i: (0, 0), pipeline_mode=pl.Buffered(1)),
            pl.BlockSpec((1, N), lambda i: (0, 0), pipeline_mode=pl.Buffered(1)),
        ],
        out_specs=pl.BlockSpec((tm, N), lambda i: (i, 0)),
        compiler_params=pltpu.CompilerParams(
            dimension_semantics=("parallel",), vmem_limit_bytes=_VMEM_LIMIT),
    )(x, w, b.reshape(1, N), res, gamma.reshape(1, N), beta.reshape(1, N))


def layernorm(x, gamma, beta, eps=1e-12, out_dtype=jnp.bfloat16):
    M, H = x.shape
    tm = _pick_row_tile(M)
    return pl.pallas_call(
        functools.partial(_ln_kernel, eps=eps),
        out_shape=jax.ShapeDtypeStruct((M, H), out_dtype),
        grid=(M // tm,),
        in_specs=[
            pl.BlockSpec((tm, H), lambda i: (i, 0)),
            pl.BlockSpec((1, H), lambda i: (0, 0), pipeline_mode=pl.Buffered(1)),
            pl.BlockSpec((1, H), lambda i: (0, 0), pipeline_mode=pl.Buffered(1)),
        ],
        out_specs=pl.BlockSpec((tm, H), lambda i: (i, 0)),
        compiler_params=pltpu.CompilerParams(
            dimension_semantics=("parallel",), vmem_limit_bytes=_VMEM_LIMIT),
    )(x, gamma.reshape(1, H), beta.reshape(1, H))


def attention(qkv, mask_add, n_heads, dh):
    B, S, threeH = qkv.shape
    H = n_heads * dh
    tq = _pick_seq_tile(S)
    return pl.pallas_call(
        functools.partial(_attention_kernel, n_heads=n_heads, dh=dh),
        out_shape=jax.ShapeDtypeStruct((B, S, H), jnp.bfloat16),
        grid=(B, S // tq),
        in_specs=[
            # full QKV slab: block index constant across query tiles -> stays resident
            pl.BlockSpec((1, S, threeH), lambda b, qi: (b, 0, 0)),
            pl.BlockSpec((1, 1, S), lambda b, qi: (b, 0, 0)),
        ],
        out_specs=pl.BlockSpec((1, tq, H), lambda b, qi: (b, qi, 0)),
        compiler_params=pltpu.CompilerParams(
            dimension_semantics=("parallel", "parallel"), vmem_limit_bytes=_VMEM_LIMIT),
    )(qkv, mask_add)


def pooler_head(cls, wp, bp, wo, bo):
    B, H = cls.shape
    C = wo.shape[1]
    return pl.pallas_call(
        _pool_head_kernel,
        out_shape=jax.ShapeDtypeStruct((B, C), jnp.float32),
        grid=(1,),
        in_specs=[
            pl.BlockSpec((B, H), lambda i: (0, 0)),
            pl.BlockSpec((H, H), lambda i: (0, 0)),
            pl.BlockSpec((1, H), lambda i: (0, 0)),
            pl.BlockSpec((H, C), lambda i: (0, 0)),
            pl.BlockSpec((1, C), lambda i: (0, 0)),
        ],
        out_specs=pl.BlockSpec((B, C), lambda i: (0, 0)),
        compiler_params=pltpu.CompilerParams(vmem_limit_bytes=_VMEM_LIMIT),
    )(cls, wp, bp.reshape(1, H), wo, bo.reshape(1, C))


# ----------------------------- model glue -----------------------------

def bert_layer(h, mask_add, p, n_heads):
    B, S, H = h.shape
    dh = H // n_heads
    x = h.reshape(B * S, H)                                   # bf16 residual stream
    # fused QKV projection: [B*S, H] @ [H, 3H] (Q columns pre-scaled by 1/sqrt(dh))
    qkv = dense(x, p["w_qkv"], p["b_qkv"])                    # bf16 [B*S, 3H]
    ctx = attention(qkv.reshape(B, S, 3 * H), mask_add, n_heads, dh)
    ctx = ctx.reshape(B * S, H)
    # output projection + residual + LN, fused
    h1 = dense_add_layernorm(ctx, p["wo"], p["bo"], x, p["ln1_g"], p["ln1_b"])
    # FFN: up-projection with GELU, then down-projection + residual + LN, fused
    ffn = dense(h1, p["w1"], p["b1"], activation="gelu")
    h2 = dense_add_layernorm(ffn, p["w2"], p["b2"], h1, p["ln2_g"], p["ln2_b"])
    return h2.reshape(B, S, H)


def sentiment_classifier_forward(params, input_ids, attention_mask, n_heads):
    B, S = input_ids.shape
    H = params["word_emb"].shape[1]
    # Embeddings (gather is XLA glue; LayerNorm runs in a Pallas kernel and emits bf16)
    emb = (jnp.take(params["word_emb"], input_ids, axis=0)
           + params["pos_emb"][:S][None, :, :]
           + params["type_emb"][0][None, None, :])
    h = layernorm(emb.reshape(B * S, H),
                  params["emb_ln_g"], params["emb_ln_b"]).reshape(B, S, H)
    # additive attention mask: 0 where attended, -1e9 where padded  ->  [B, 1, S] (f32)
    mask_add = (1.0 - attention_mask.astype(jnp.float32))[:, None, :] * jnp.float32(-1e9)

    for layer_p in params["layers"]:
        h = bert_layer(h, mask_add, layer_p, n_heads)

    # BERT pooler (tanh on CLS token) + classifier head, fused in one kernel.
    # TODO(synk): nn.Dropout(p=0.3) is identity in eval/inference; training-mode RNG dropout omitted.
    cls = h[:, 0, :]
    logits = pooler_head(cls, params["pool_w"], params["pool_b"],
                         params["out_w"], params["out_b"])
    return logits


def init_params(key, *, vocab, max_pos, hidden, inter, layers, n_classes, n_heads):
    std = 0.02
    keys = iter(jax.random.split(key, 8 + 12 * layers))

    def w(shape, dtype=jnp.bfloat16):
        return (std * jax.random.normal(next(keys), shape, jnp.float32)).astype(dtype)

    dh = hidden // n_heads
    scale = jnp.float32(1.0 / math.sqrt(dh))

    params = {
        "word_emb": w((vocab, hidden), jnp.float32),
        "pos_emb": w((max_pos, hidden), jnp.float32),
        "type_emb": w((2, hidden), jnp.float32),
        "emb_ln_g": jnp.ones((hidden,), jnp.float32),
        "emb_ln_b": jnp.zeros((hidden,), jnp.float32),
        "layers": [],
        "pool_w": w((hidden, hidden)),
        "pool_b": jnp.zeros((hidden,), jnp.float32),
        "out_w": w((hidden, n_classes)),
        "out_b": jnp.zeros((n_classes,), jnp.float32),
    }
    for _ in range(layers):
        # fold the 1/sqrt(dh) attention scale into the Q projection (constant fold, once)
        wq = w((hidden, hidden), jnp.float32) * scale
        wk = w((hidden, hidden), jnp.float32)
        wv = w((hidden, hidden), jnp.float32)
        params["layers"].append({
            "w_qkv": jnp.concatenate([wq, wk, wv], axis=1).astype(jnp.bfloat16),
            "b_qkv": jnp.zeros((3 * hidden,), jnp.float32),   # Q bias would also be scaled; zero here
            "wo": w((hidden, hidden)), "bo": jnp.zeros((hidden,), jnp.float32),
            "ln1_g": jnp.ones((hidden,), jnp.float32),
            "ln1_b": jnp.zeros((hidden,), jnp.float32),
            "w1": w((hidden, inter)), "b1": jnp.zeros((inter,), jnp.float32),
            "w2": w((inter, hidden)), "b2": jnp.zeros((hidden,), jnp.float32),
            "ln2_g": jnp.ones((hidden,), jnp.float32),
            "ln2_b": jnp.zeros((hidden,), jnp.float32),
        })
    return params


if __name__ == "__main__":
    # small synthetic-BERT config (same forward structure as bert-base)
    B, S = 2, 8
    VOCAB, MAX_POS, HIDDEN, HEADS, INTER, LAYERS, N_CLASSES = 100, 16, 32, 2, 64, 2, 3

    key = jax.random.PRNGKey(0)
    k_params, k_ids = jax.random.split(key)
    params = init_params(k_params, vocab=VOCAB, max_pos=MAX_POS, hidden=HIDDEN,
                         inter=INTER, layers=LAYERS, n_classes=N_CLASSES, n_heads=HEADS)

    input_ids = jax.random.randint(k_ids, (B, S), 0, VOCAB, dtype=jnp.int32)
    attention_mask = jnp.array(
        [[1] * S, [1] * (S - 2) + [0, 0]], dtype=jnp.int32)  # second example has padding

    fwd = jax.jit(functools.partial(sentiment_classifier_forward, n_heads=HEADS))
    logits = fwd(params, input_ids, attention_mask)
    jax.block_until_ready(logits)
    assert logits.shape == (B, N_CLASSES)
    assert bool(jnp.all(jnp.isfinite(logits)))
    print("KERNEL_OK")
</pallas_src>

<mosaic_0001>
module attributes {stable_mosaic.version = 11 : i64} {
  func.func @_ln_kernel(%arg0: i32, %arg1: memref<16x32xf32, #tpu.memory_space<vmem>>, %arg2: memref<1x32xf32, #tpu.memory_space<vmem>>, %arg3: memref<1x32xf32, #tpu.memory_space<vmem>>, %arg4: memref<16x32xbf16, #tpu.memory_space<vmem>>) attributes {dimension_semantics = [#tpu.dimension_semantics<parallel>], iteration_bounds = array<i64: 1>, scalar_prefetch = 0 : i64, scratch_operands = 0 : i64, tpu.core_type = #tpu.core_type<tc>, window_params = [{transform_indices = @transform_0, window_bounds = array<i64: 16, 32>}, {pipeline_mode = #tpu.pipeline_mode<synchronous>, transform_indices = @transform_1, window_bounds = array<i64: 1, 32>}, {pipeline_mode = #tpu.pipeline_mode<synchronous>, transform_indices = @transform_2, window_bounds = array<i64: 1, 32>}, {transform_indices = @transform_3, window_bounds = array<i64: 16, 32>}]} {
    %c0 = arith.constant 0 : index
    %c0_0 = arith.constant 0 : index
    %0 = vector.load %arg1[%c0, %c0_0] : memref<16x32xf32, #tpu.memory_space<vmem>>, vector<16x32xf32>
    %cst = arith.constant dense<0.000000e+00> : vector<16xf32>
    %1 = vector.multi_reduction <add>, %0, %cst [1] : vector<16x32xf32> to vector<16xf32>
    %2 = vector.shape_cast %1 : vector<16xf32> to vector<16x1xf32>
    %cst_1 = arith.constant 3.200000e+01 : f32
    %3 = vector.broadcast %cst_1 : f32 to vector<16x1xf32>
    %4 = arith.divf %2, %3 : vector<16x1xf32>
    %5 = vector.broadcast %4 : vector<16x1xf32> to vector<16x32xf32>
    %6 = arith.subf %0, %5 : vector<16x32xf32>
    %7 = vector.broadcast %4 : vector<16x1xf32> to vector<16x32xf32>
    %8 = arith.subf %0, %7 : vector<16x32xf32>
    %9 = arith.mulf %6, %8 : vector<16x32xf32>
    %cst_2 = arith.constant dense<0.000000e+00> : vector<16xf32>
    %10 = vector.multi_reduction <add>, %9, %cst_2 [1] : vector<16x32xf32> to vector<16xf32>
    %11 = vector.shape_cast %10 : vector<16xf32> to vector<16x1xf32>
    %cst_3 = arith.constant 3.200000e+01 : f32
    %12 = vector.broadcast %cst_3 : f32 to vector<16x1xf32>
    %13 = arith.divf %11, %12 : vector<16x1xf32>
    %14 = vector.broadcast %4 : vector<16x1xf32> to vector<16x32xf32>
    %15 = arith.subf %0, %14 : vector<16x32xf32>
    %cst_4 = arith.constant 9.99999996E-13 : f32
    %16 = vector.broadcast %cst_4 : f32 to vector<16x1xf32>
    %17 = arith.addf %13, %16 : vector<16x1xf32>
    %18 = math.rsqrt %17 : vector<16x1xf32>
    %19 = vector.broadcast %18 : vector<16x1xf32> to vector<16x32xf32>
    %20 = arith.mulf %15, %19 : vector<16x32xf32>
    %c0_5 = arith.constant 0 : index
    %c0_6 = arith.constant 0 : index
    %21 = vector.load %arg2[%c0_5, %c0_6] : memref<1x32xf32, #tpu.memory_space<vmem>>, vector<1x32xf32>
    %22 = vector.broadcast %21 : vector<1x32xf32> to vector<16x32xf32>
    %23 = arith.mulf %20, %22 : vector<16x32xf32>
    %c0_7 = arith.constant 0 : index
    %c0_8 = arith.constant 0 : index
    %24 = vector.load %arg3[%c0_7, %c0_8] : memref<1x32xf32, #tpu.memory_space<vmem>>, vector<1x32xf32>
    %25 = vector.broadcast %24 : vector<1x32xf32> to vector<16x32xf32>
    %26 = arith.addf %23, %25 : vector<16x32xf32>
    %27 = arith.truncf %26 : vector<16x32xf32> to vector<16x32xbf16>
    %c0_9 = arith.constant 0 : index
    %c0_10 = arith.constant 0 : index
    %28 = vector.load %arg4[%c0_9, %c0_10] : memref<16x32xbf16, #tpu.memory_space<vmem>>, vector<16x32xbf16>
    tpu.vector_store %arg4[%c0_9, %c0_10], %27 {strides = array<i32>} : memref<16x32xbf16, #tpu.memory_space<vmem>>, vector<16x32xbf16>,
    return
  }
  func.func @transform_0(%arg0: i32) -> (i32, i32) {
    %c0_i32 = arith.constant 0 : i32
    %c0_i32_0 = arith.constant 0 : i32
    return %arg0, %c0_i32 : i32, i32
  }
  func.func @transform_1(%arg0: i32) -> (i32, i32) {
    %c0_i32 = arith.constant 0 : i32
    %c0_i32_0 = arith.constant 0 : i32
    %c0_i32_1 = arith.constant 0 : i32
    return %c0_i32, %c0_i32_0 : i32, i32
  }
  func.func @transform_2(%arg0: i32) -> (i32, i32) {
    %c0_i32 = arith.constant 0 : i32
    %c0_i32_0 = arith.constant 0 : i32
    %c0_i32_1 = arith.constant 0 : i32
    return %c0_i32, %c0_i32_0 : i32, i32
  }
  func.func @transform_3(%arg0: i32) -> (i32, i32) {
    %c0_i32 = arith.constant 0 : i32
    %c0_i32_0 = arith.constant 0 : i32
    return %arg0, %c0_i32 : i32, i32
  }
}

module attributes {stable_mosaic.version = 11 : i64} {
  func.func @_dense_kernel(%arg0: i32, %arg1: memref<16x32xbf16, #tpu.memory_space<vmem>>, %arg2: memref<32x96xbf16, #tpu.memory_space<vmem>>, %arg3: memref<1x96xf32, #tpu.memory_space<vmem>>, %arg4: memref<16x96xbf16, #tpu.memory_space<vmem>>) attributes {dimension_semantics = [#tpu.dimension_semantics<parallel>], iteration_bounds = array<i64: 1>, scalar_prefetch = 0 : i64, scratch_operands = 0 : i64, tpu.core_type = #tpu.core_type<tc>, window_params = [{transform_indices = @transform_0, window_bounds = array<i64: 16, 32>}, {pipeline_mode = #tpu.pipeline_mode<synchronous>, transform_indices = @transform_1, window_bounds = array<i64: 32, 96>}, {pipeline_mode = #tpu.pipeline_mode<synchronous>, transform_indices = @transform_2, window_bounds = array<i64: 1, 96>}, {transform_indices = @transform_3, window_bounds = array<i64: 16, 96>}]} {
    %c0 = arith.constant 0 : index
    %c0_0 = arith.constant 0 : index
    %0 = vector.load %arg1[%c0, %c0_0] : memref<16x32xbf16, #tpu.memory_space<vmem>>, vector<16x32xbf16>
    %c0_1 = arith.constant 0 : index
    %c0_2 = arith.constant 0 : index
    %1 = vector.load %arg2[%c0_1, %c0_2] : memref<32x96xbf16, #tpu.memory_space<vmem>>, vector<32x96xbf16>
    %cst = arith.constant dense<0.000000e+00> : vector<16x96xf32>
    %2 = tpu.matmul %0, %1, %cst {dimension_numbers = #tpu.dot_dimension_numbers<[1], [0], [0], [1], [0, 0, 1, 1], [], []>} : vector<16x32xbf16>, vector<32x96xbf16>, vector<16x96xf32> -> vector<16x96xf32>
    %c0_3 = arith.constant 0 : index
    %c0_4 = arith.constant 0 : index
    %3 = vector.load %arg3[%c0_3, %c0_4] : memref<1x96xf32, #tpu.memory_space<vmem>>, vector<1x96xf32>
    %4 = vector.broadcast %3 : vector<1x96xf32> to vector<16x96xf32>
    %5 = arith.addf %2, %4 : vector<16x96xf32>
    %6 = arith.truncf %5 : vector<16x96xf32> to vector<16x96xbf16>
    %c0_5 = arith.constant 0 : index
    %c0_6 = arith.constant 0 : index
    %7 = vector.load %arg4[%c0_5, %c0_6] : memref<16x96xbf16, #tpu.memory_space<vmem>>, vector<16x96xbf16>
    tpu.vector_store %arg4[%c0_5, %c0_6], %6 {strides = array<i32>} : memref<16x96xbf16, #tpu.memory_space<vmem>>, vector<16x96xbf16>,
    return
  }
  func.func @transform_0(%arg0: i32) -> (i32, i32) {
    %c0_i32 = arith.constant 0 : i32
    %c0_i32_0 = arith.constant 0 : i32
    return %arg0, %c0_i32 : i32, i32
  }
  func.func @transform_1(%arg0: i32) -> (i32, i32) {
    %c0_i32 = arith.constant 0 : i32
    %c0_i32_0 = arith.constant 0 : i32
    %c0_i32_1 = arith.constant 0 : i32
    return %c0_i32, %c0_i32_0 : i32, i32
  }
  func.func @transform_2(%arg0: i32) -> (i32, i32) {
    %c0_i32 = arith.constant 0 : i32
    %c0_i32_0 = arith.constant 0 : i32
    %c0_i32_1 = arith.constant 0 : i32
    return %c0_i32, %c0_i32_0 : i32, i32
  }
  func.func @transform_3(%arg0: i32) -> (i32, i32) {
    %c0_i32 = arith.constant 0 : i32
    %c0_i32_0 = arith.constant 0 : i32
    return %arg0, %c0_i32 : i32, i32
  }
}

module attributes {stable_mosaic.version = 11 : i64} {
  func.func @_dense_add_ln_kernel(%arg0: i32, %arg1: memref<16x32xbf16, #tpu.memory_space<vmem>>, %arg2: memref<32x32xbf16, #tpu.memory_space<vmem>>, %arg3: memref<1x32xf32, #tpu.memory_space<vmem>>, %arg4: memref<16x32xbf16, #tpu.memory_space<vmem>>, %arg5: memref<1x32xf32, #tpu.memory_space<vmem>>, %arg6: memref<1x32xf32, #tpu.memory_space<vmem>>, %arg7: memref<16x32xbf16, #tpu.memory_space<vmem>>) attributes {dimension_semantics = [#tpu.dimension_semantics<parallel>], iteration_bounds = array<i64: 1>, scalar_prefetch = 0 : i64, scratch_operands = 0 : i64, tpu.core_type = #tpu.core_type<tc>, window_params = [{transform_indices = @transform_0, window_bounds = array<i64: 16, 32>}, {pipeline_mode = #tpu.pipeline_mode<synchronous>, transform_indices = @transform_1, window_bounds = array<i64: 32, 32>}, {pipeline_mode = #tpu.pipeline_mode<synchronous>, transform_indices = @transform_2, window_bounds = array<i64: 1, 32>}, {transform_indices = @transform_3, window_bounds = array<i64: 16, 32>}, {pipeline_mode = #tpu.pipeline_mode<synchronous>, transform_indices = @transform_4, window_bounds = array<i64: 1, 32>}, {pipeline_mode = #tpu.pipeline_mode<synchronous>, transform_indices = @transform_5, window_bounds = array<i64: 1, 32>}, {transform_indices = @transform_6, window_bounds = array<i64: 16, 32>}]} {
    %c0 = arith.constant 0 : index
    %c0_0 = arith.constant 0 : index
    %0 = vector.load %arg1[%c0, %c0_0] : memref<16x32xbf16, #tpu.memory_space<vmem>>, vector<16x32xbf16>
    %c0_1 = arith.constant 0 : index
    %c0_2 = arith.constant 0 : index
    %1 = vector.load %arg2[%c0_1, %c0_2] : memref<32x32xbf16, #tpu.memory_space<vmem>>, vector<32x32xbf16>
    %cst = arith.constant dense<0.000000e+00> : vector<16x32xf32>
    %2 = tpu.matmul %0, %1, %cst {dimension_numbers = #tpu.dot_dimension_numbers<[1], [0], [0], [1], [0, 0, 1, 1], [], []>} : vector<16x32xbf16>, vector<32x32xbf16>, vector<16x32xf32> -> vector<16x32xf32>
    %c0_3 = arith.constant 0 : index
    %c0_4 = arith.constant 0 : index
    %3 = vector.load %arg3[%c0_3, %c0_4] : memref<1x32xf32, #tpu.memory_space<vmem>>, vector<1x32xf32>
    %4 = vector.broadcast %3 : vector<1x32xf32> to vector<16x32xf32>
    %5 = arith.addf %2, %4 : vector<16x32xf32>
    %c0_5 = arith.constant 0 : index
    %c0_6 = arith.constant 0 : index
    %6 = vector.load %arg4[%c0_5, %c0_6] : memref<16x32xbf16, #tpu.memory_space<vmem>>, vector<16x32xbf16>
    %7 = arith.extf %6 : vector<16x32xbf16> to vector<16x32xf32>
    %8 = arith.addf %5, %7 : vector<16x32xf32>
    %cst_7 = arith.constant dense<0.000000e+00> : vector<16xf32>
    %9 = vector.multi_reduction <add>, %8, %cst_7 [1] : vector<16x32xf32> to vector<16xf32>
    %10 = vector.shape_cast %9 : vector<16xf32> to vector<16x1xf32>
    %cst_8 = arith.constant 3.200000e+01 : f32
    %11 = vector.broadcast %cst_8 : f32 to vector<16x1xf32>
    %12 = arith.divf %10, %11 : vector<16x1xf32>
    %13 = vector.broadcast %12 : vector<16x1xf32> to vector<16x32xf32>
    %14 = arith.subf %8, %13 : vector<16x32xf32>
    %15 = vector.broadcast %12 : vector<16x1xf32> to vector<16x32xf32>
    %16 = arith.subf %8, %15 : vector<16x32xf32>
    %17 = arith.mulf %14, %16 : vector<16x32xf32>
    %cst_9 = arith.constant dense<0.000000e+00> : vector<16xf32>
    %18 = vector.multi_reduction <add>, %17, %cst_9 [1] : vector<16x32xf32> to vector<16xf32>
    %19 = vector.shape_cast %18 : vector<16xf32> to vector<16x1xf32>
    %cst_10 = arith.constant 3.200000e+01 : f32
    %20 = vector.broadcast %cst_10 : f32 to vector<16x1xf32>
    %21 = arith.divf %19, %20 : vector<16x1xf32>
    %22 = vector.broadcast %12 : vector<16x1xf32> to vector<16x32xf32>
    %23 = arith.subf %8, %22 : vector<16x32xf32>
    %cst_11 = arith.constant 9.99999996E-13 : f32
    %24 = vector.broadcast %cst_11 : f32 to vector<16x1xf32>
    %25 = arith.addf %21, %24 : vector<16x1xf32>
    %26 = math.rsqrt %25 : vector<16x1xf32>
    %27 = vector.broadcast %26 : vector<16x1xf32> to vector<16x32xf32>
    %28 = arith.mulf %23, %27 : vector<16x32xf32>
    %c0_12 = arith.constant 0 : index
    %c0_13 = arith.constant 0 : index
    %29 = vector.load %arg5[%c0_12, %c0_13] : memref<1x32xf32, #tpu.memory_space<vmem>>, vector<1x32xf32>
    %30 = vector.broadcast %29 : vector<1x32xf32> to vector<16x32xf32>
    %31 = arith.mulf %28, %30 : vector<16x32xf32>
    %c0_14 = arith.constant 0 : index
    %c0_15 = arith.constant 0 : index
    %32 = vector.load %arg6[%c0_14, %c0_15] : memref<1x32xf32, #tpu.memory_space<vmem>>, vector<1x32xf32>
    %33 = vector.broadcast %32 : vector<1x32xf32> to vector<16x32xf32>
    %34 = arith.addf %31, %33 : vector<16x32xf32>
    %35 = arith.truncf %34 : vector<16x32xf32> to vector<16x32xbf16>
    %c0_16 = arith.constant 0 : index
    %c0_17 = arith.constant 0 : index
    %36 = vector.load %arg7[%c0_16, %c0_17] : memref<16x32xbf16, #tpu.memory_space<vmem>>, vector<16x32xbf16>
    tpu.vector_store %arg7[%c0_16, %c0_17], %35 {strides = array<i32>} : memref<16x32xbf16, #tpu.memory_space<vmem>>, vector<16x32xbf16>,
    return
  }
  func.func @transform_0(%arg0: i32) -> (i32, i32) {
    %c0_i32 = arith.constant 0 : i32
    %c0_i32_0 = arith.constant 0 : i32
    return %arg0, %c0_i32 : i32, i32
  }
  func.func @transform_1(%arg0: i32) -> (i32, i32) {
    %c0_i32 = arith.constant 0 : i32
    %c0_i32_0 = arith.constant 0 : i32
    %c0_i32_1 = arith.constant 0 : i32
    return %c0_i32, %c0_i32_0 : i32, i32
  }
  func.func @transform_2(%arg0: i32) -> (i32, i32) {
    %c0_i32 = arith.constant 0 : i32
    %c0_i32_0 = arith.constant 0 : i32
    %c0_i32_1 = arith.constant 0 : i32
    return %c0_i32, %c0_i32_0 : i32, i32
  }
  func.func @transform_3(%arg0: i32) -> (i32, i32) {
    %c0_i32 = arith.constant 0 : i32
    %c0_i32_0 = arith.constant 0 : i32
    return %arg0, %c0_i32 : i32, i32
  }
  func.func @transform_4(%arg0: i32) -> (i32, i32) {
    %c0_i32 = arith.constant 0 : i32
    %c0_i32_0 = arith.constant 0 : i32
    %c0_i32_1 = arith.constant 0 : i32
    return %c0_i32, %c0_i32_0 : i32, i32
  }
  func.func @transform_5(%arg0: i32) -> (i32, i32) {
    %c0_i32 = arith.constant 0 : i32
    %c0_i32_0 = arith.constant 0 : i32
    %c0_i32_1 = arith.constant 0 : i32
    return %c0_i32, %c0_i32_0 : i32, i32
  }
  func.func @transform_6(%arg0: i32) -> (i32, i32) {
    %c0_i32 = arith.constant 0 : i32
    %c0_i32_0 = arith.constant 0 : i32
    return %arg0, %c0_i32 : i32, i32
  }
}

module attributes {stable_mosaic.version = 11 : i64} {
  func.func @_attention_kernel(%arg0: i32, %arg1: i32, %arg2: memref<1x8x96xbf16, #tpu.memory_space<vmem>>, %arg3: memref<1x1x8xf32, #tpu.memory_space<vmem>>, %arg4: memref<1x8x32xbf16, #tpu.memory_space<vmem>>) attributes {dimension_semantics = [#tpu.dimension_semantics<parallel>, #tpu.dimension_semantics<parallel>], iteration_bounds = array<i64: 2, 1>, scalar_prefetch = 0 : i64, scratch_operands = 0 : i64, tpu.core_type = #tpu.core_type<tc>, window_params = [{transform_indices = @transform_0, window_bounds = array<i64: 1, 8, 96>}, {transform_indices = @transform_1, window_bounds = array<i64: 1, 1, 8>}, {transform_indices = @transform_2, window_bounds = array<i64: 1, 8, 32>}]} {
    %c8_i32 = arith.constant 8 : i32
    %0 = arith.muli %arg1, %c8_i32 : i32
    %1 = tpu.assume_multiple %0, 8 : i32
    %c0 = arith.constant 0 : index
    %c0_0 = arith.constant 0 : index
    %c0_1 = arith.constant 0 : index
    %2 = vector.load %arg3[%c0, %c0_0, %c0_1] : memref<1x1x8xf32, #tpu.memory_space<vmem>>, vector<1x1x8xf32>
    %3 = vector.shape_cast %2 : vector<1x1x8xf32> to vector<1x8xf32>
    %c0_2 = arith.constant 0 : index
    %4 = arith.index_cast %1 : i32 to index
    %c0_3 = arith.constant 0 : index
    %5 = vector.load %arg2[%c0_2, %4, %c0_3] : memref<1x8x96xbf16, #tpu.memory_space<vmem>>, vector<1x8x16xbf16>
    %6 = vector.shape_cast %5 : vector<1x8x16xbf16> to vector<8x16xbf16>
    %c0_4 = arith.constant 0 : index
    %c0_5 = arith.constant 0 : index
    %c32 = arith.constant 32 : index
    %7 = vector.load %arg2[%c0_4, %c0_5, %c32] : memref<1x8x96xbf16, #tpu.memory_space<vmem>>, vector<1x8x16xbf16>
    %8 = vector.shape_cast %7 : vector<1x8x16xbf16> to vector<8x16xbf16>
    %c0_6 = arith.constant 0 : index
    %c0_7 = arith.constant 0 : index
    %c64 = arith.constant 64 : index
    %9 = vector.load %arg2[%c0_6, %c0_7, %c64] : memref<1x8x96xbf16, #tpu.memory_space<vmem>>, vector<1x8x16xbf16>
    %10 = vector.shape_cast %9 : vector<1x8x16xbf16> to vector<8x16xbf16>
    %cst = arith.constant dense<0.000000e+00> : vector<8x8xf32>
    %11 = tpu.matmul %6, %8, %cst {dimension_numbers = #tpu.dot_dimension_numbers<[1], [1], [0], [0], [0, 0, 1, 0], [], []>} : vector<8x16xbf16>, vector<8x16xbf16>, vector<8x8xf32> -> vector<8x8xf32>
    %12 = vector.broadcast %3 : vector<1x8xf32> to vector<8x8xf32>
    %13 = arith.addf %11, %12 : vector<8x8xf32>
    %cst_8 = arith.constant dense<0xFF800000> : vector<8xf32>
    %14 = vector.multi_reduction <maximumf>, %13, %cst_8 [1] : vector<8x8xf32> to vector<8xf32>
    %15 = vector.shape_cast %14 : vector<8xf32> to vector<8x1xf32>
    %16 = vector.broadcast %15 : vector<8x1xf32> to vector<8x8xf32>
    %17 = arith.subf %13, %16 : vector<8x8xf32>
    %18 = math.exp %17 : vector<8x8xf32>
    %cst_9 = arith.constant dense<0.000000e+00> : vector<8xf32>
    %19 = vector.multi_reduction <add>, %18, %cst_9 [1] : vector<8x8xf32> to vector<8xf32>
    %20 = vector.shape_cast %19 : vector<8xf32> to vector<8x1xf32>
    %21 = tpu.reciprocal %20 {approx = true} : vector<8x1xf32> -> vector<8x1xf32>
    %22 = vector.broadcast %21 : vector<8x1xf32> to vector<8x8xf32>
    %23 = arith.mulf %18, %22 : vector<8x8xf32>
    %24 = arith.truncf %23 : vector<8x8xf32> to vector<8x8xbf16>
    %cst_10 = arith.constant dense<0.000000e+00> : vector<8x16xf32>
    %25 = tpu.matmul %24, %10, %cst_10 {dimension_numbers = #tpu.dot_dimension_numbers<[1], [0], [0], [1], [0, 0, 1, 1], [], []>} : vector<8x8xbf16>, vector<8x16xbf16>, vector<8x16xf32> -> vector<8x16xf32>
    %c0_11 = arith.constant 0 : index
    %26 = arith.index_cast %1 : i32 to index
    %c16 = arith.constant 16 : index
    %27 = vector.load %arg2[%c0_11, %26, %c16] : memref<1x8x96xbf16, #tpu.memory_space<vmem>>, vector<1x8x16xbf16>
    %28 = vector.shape_cast %27 : vector<1x8x16xbf16> to vector<8x16xbf16>
    %c0_12 = arith.constant 0 : index
    %c0_13 = arith.constant 0 : index
    %c48 = arith.constant 48 : index
    %29 = vector.load %arg2[%c0_12, %c0_13, %c48] : memref<1x8x96xbf16, #tpu.memory_space<vmem>>, vector<1x8x16xbf16>
    %30 = vector.shape_cast %29 : vector<1x8x16xbf16> to vector<8x16xbf16>
    %c0_14 = arith.constant 0 : index
    %c0_15 = arith.constant 0 : index
    %c80 = arith.constant 80 : index
    %31 = vector.load %arg2[%c0_14, %c0_15, %c80] : memref<1x8x96xbf16, #tpu.memory_space<vmem>>, vector<1x8x16xbf16>
    %32 = vector.shape_cast %31 : vector<1x8x16xbf16> to vector<8x16xbf16>
    %cst_16 = arith.constant dense<0.000000e+00> : vector<8x8xf32>
    %33 = tpu.matmul %28, %30, %cst_16 {dimension_numbers = #tpu.dot_dimension_numbers<[1], [1], [0], [0], [0, 0, 1, 0], [], []>} : vector<8x16xbf16>, vector<8x16xbf16>, vector<8x8xf32> -> vector<8x8xf32>
    %34 = vector.broadcast %3 : vector<1x8xf32> to vector<8x8xf32>
    %35 = arith.addf %33, %34 : vector<8x8xf32>
    %cst_17 = arith.constant dense<0xFF800000> : vector<8xf32>
    %36 = vector.multi_reduction <maximumf>, %35, %cst_17 [1] : vector<8x8xf32> to vector<8xf32>
    %37 = vector.shape_cast %36 : vector<8xf32> to vector<8x1xf32>
    %38 = vector.broadcast %37 : vector<8x1xf32> to vector<8x8xf32>
    %39 = arith.subf %35, %38 : vector<8x8xf32>
    %40 = math.exp %39 : vector<8x8xf32>
    %cst_18 = arith.constant dense<0.000000e+00> : vector<8xf32>
    %41 = vector.multi_reduction <add>, %40, %cst_18 [1] : vector<8x8xf32> to vector<8xf32>
    %42 = vector.shape_cast %41 : vector<8xf32> to vector<8x1xf32>
    %43 = tpu.reciprocal %42 {approx = true} : vector<8x1xf32> -> vector<8x1xf32>
    %44 = vector.broadcast %43 : vector<8x1xf32> to vector<8x8xf32>
    %45 = arith.mulf %40, %44 : vector<8x8xf32>
    %46 = arith.truncf %45 : vector<8x8xf32> to vector<8x8xbf16>
    %cst_19 = arith.constant dense<0.000000e+00> : vector<8x16xf32>
    %47 = tpu.matmul %46, %32, %cst_19 {dimension_numbers = #tpu.dot_dimension_numbers<[1], [0], [0], [1], [0, 0, 1, 1], [], []>} : vector<8x8xbf16>, vector<8x16xbf16>, vector<8x16xf32> -> vector<8x16xf32>
    %48 = tpu.concatenate %25, %47 in 1 : vector<8x16xf32>, vector<8x16xf32> -> vector<8x32xf32>
    %49 = arith.truncf %48 : vector<8x32xf32> to vector<8x32xbf16>
    %c0_20 = arith.constant 0 : index
    %c0_21 = arith.constant 0 : index
    %c0_22 = arith.constant 0 : index
    %50 = vector.load %arg4[%c0_20, %c0_21, %c0_22] : memref<1x8x32xbf16, #tpu.memory_space<vmem>>, vector<1x8x32xbf16>
    %51 = vector.shape_cast %50 : vector<1x8x32xbf16> to vector<8x32xbf16>
    %52 = vector.shape_cast %49 : vector<8x32xbf16> to vector<1x8x32xbf16>
    tpu.vector_store %arg4[%c0_20, %c0_21, %c0_22], %52 {strides = array<i32>} : memref<1x8x32xbf16, #tpu.memory_space<vmem>>, vector<1x8x32xbf16>,
    return
  }
  func.func @transform_0(%arg0: i32, %arg1: i32) -> (i32, i32, i32) {
    %c0_i32 = arith.constant 0 : i32
    %c0_i32_0 = arith.constant 0 : i32
    %c0_i32_1 = arith.constant 0 : i32
    return %arg0, %c0_i32, %c0_i32_0 : i32, i32, i32
  }
  func.func @transform_1(%arg0: i32, %arg1: i32) -> (i32, i32, i32) {
    %c0_i32 = arith.constant 0 : i32
    %c0_i32_0 = arith.constant 0 : i32
    %c0_i32_1 = arith.constant 0 : i32
    return %arg0, %c0_i32, %c0_i32_0 : i32, i32, i32
  }
  func.func @transform_2(%arg0: i32, %arg1: i32) -> (i32, i32, i32) {
    %c0_i32 = arith.constant 0 : i32
    %c0_i32_0 = arith.constant 0 : i32
    return %arg0, %arg1, %c0_i32 : i32, i32, i32
  }
}

module attributes {stable_mosaic.version = 11 : i64} {
  func.func @_dense_kernel(%arg0: i32, %arg1: memref<16x32xbf16, #tpu.memory_space<vmem>>, %arg2: memref<32x64xbf16, #tpu.memory_space<vmem>>, %arg3: memref<1x64xf32, #tpu.memory_space<vmem>>, %arg4: memref<16x64xbf16, #tpu.memory_space<vmem>>) attributes {dimension_semantics = [#tpu.dimension_semantics<parallel>], iteration_bounds = array<i64: 1>, scalar_prefetch = 0 : i64, scratch_operands = 0 : i64, tpu.core_type = #tpu.core_type<tc>, window_params = [{transform_indices = @transform_0, window_bounds = array<i64: 16, 32>}, {pipeline_mode = #tpu.pipeline_mode<synchronous>, transform_indices = @transform_1, window_bounds = array<i64: 32, 64>}, {pipeline_mode = #tpu.pipeline_mode<synchronous>, transform_indices = @transform_2, window_bounds = array<i64: 1, 64>}, {transform_indices = @transform_3, window_bounds = array<i64: 16, 64>}]} {
    %c0 = arith.constant 0 : index
    %c0_0 = arith.constant 0 : index
    %0 = vector.load %arg1[%c0, %c0_0] : memref<16x32xbf16, #tpu.memory_space<vmem>>, vector<16x32xbf16>
    %c0_1 = arith.constant 0 : index
    %c0_2 = arith.constant 0 : index
    %1 = vector.load %arg2[%c0_1, %c0_2] : memref<32x64xbf16, #tpu.memory_space<vmem>>, vector<32x64xbf16>
    %cst = arith.constant dense<0.000000e+00> : vector<16x64xf32>
    %2 = tpu.matmul %0, %1, %cst {dimension_numbers = #tpu.dot_dimension_numbers<[1], [0], [0], [1], [0, 0, 1, 1], [], []>} : vector<16x32xbf16>, vector<32x64xbf16>, vector<16x64xf32> -> vector<16x64xf32>
    %c0_3 = arith.constant 0 : index
    %c0_4 = arith.constant 0 : index
    %3 = vector.load %arg3[%c0_3, %c0_4] : memref<1x64xf32, #tpu.memory_space<vmem>>, vector<1x64xf32>
    %4 = vector.broadcast %3 : vector<1x64xf32> to vector<16x64xf32>
    %5 = arith.addf %2, %4 : vector<16x64xf32>
    %cst_5 = arith.constant 5.000000e-01 : f32
    %6 = vector.broadcast %cst_5 : f32 to vector<16x64xf32>
    %7 = arith.mulf %6, %5 : vector<16x64xf32>
    %cst_6 = arith.constant 4.471500e-02 : f32
    %8 = vector.broadcast %cst_6 : f32 to vector<16x64xf32>
    %9 = arith.mulf %8, %5 : vector<16x64xf32>
    %10 = arith.mulf %9, %5 : vector<16x64xf32>
    %11 = arith.mulf %10, %5 : vector<16x64xf32>
    %12 = arith.addf %5, %11 : vector<16x64xf32>
    %cst_7 = arith.constant 0.797884583 : f32
    %13 = vector.broadcast %cst_7 : f32 to vector<16x64xf32>
    %14 = arith.mulf %13, %12 : vector<16x64xf32>
    %15 = math.tanh %14 : vector<16x64xf32>
    %cst_8 = arith.constant 1.000000e+00 : f32
    %16 = vector.broadcast %cst_8 : f32 to vector<16x64xf32>
    %17 = arith.addf %16, %15 : vector<16x64xf32>
    %18 = arith.mulf %7, %17 : vector<16x64xf32>
    %19 = arith.truncf %18 : vector<16x64xf32> to vector<16x64xbf16>
    %c0_9 = arith.constant 0 : index
    %c0_10 = arith.constant 0 : index
    %20 = vector.load %arg4[%c0_9, %c0_10] : memref<16x64xbf16, #tpu.memory_space<vmem>>, vector<16x64xbf16>
    tpu.vector_store %arg4[%c0_9, %c0_10], %19 {strides = array<i32>} : memref<16x64xbf16, #tpu.memory_space<vmem>>, vector<16x64xbf16>,
    return
  }
  func.func @transform_0(%arg0: i32) -> (i32, i32) {
    %c0_i32 = arith.constant 0 : i32
    %c0_i32_0 = arith.constant 0 : i32
    return %arg0, %c0_i32 : i32, i32
  }
  func.func @transform_1(%arg0: i32) -> (i32, i32) {
    %c0_i32 = arith.constant 0 : i32
    %c0_i32_0 = arith.constant 0 : i32
    %c0_i32_1 = arith.constant 0 : i32
    return %c0_i32, %c0_i32_0 : i32, i32
  }
  func.func @transform_2(%arg0: i32) -> (i32, i32) {
    %c0_i32 = arith.constant 0 : i32
    %c0_i32_0 = arith.constant 0 : i32
    %c0_i32_1 = arith.constant 0 : i32
    return %c0_i32, %c0_i32_0 : i32, i32
  }
  func.func @transform_3(%arg0: i32) -> (i32, i32) {
    %c0_i32 = arith.constant 0 : i32
    %c0_i32_0 = arith.constant 0 : i32
    return %arg0, %c0_i32 : i32, i32
  }
}

module attributes {stable_mosaic.version = 11 : i64} {
  func.func @_dense_add_ln_kernel(%arg0: i32, %arg1: memref<16x64xbf16, #tpu.memory_space<vmem>>, %arg2: memref<64x32xbf16, #tpu.memory_space<vmem>>, %arg3: memref<1x32xf32, #tpu.memory_space<vmem>>, %arg4: memref<16x32xbf16, #tpu.memory_space<vmem>>, %arg5: memref<1x32xf32, #tpu.memory_space<vmem>>, %arg6: memref<1x32xf32, #tpu.memory_space<vmem>>, %arg7: memref<16x32xbf16, #tpu.memory_space<vmem>>) attributes {dimension_semantics = [#tpu.dimension_semantics<parallel>], iteration_bounds = array<i64: 1>, scalar_prefetch = 0 : i64, scratch_operands = 0 : i64, tpu.core_type = #tpu.core_type<tc>, window_params = [{transform_indices = @transform_0, window_bounds = array<i64: 16, 64>}, {pipeline_mode = #tpu.pipeline_mode<synchronous>, transform_indices = @transform_1, window_bounds = array<i64: 64, 32>}, {pipeline_mode = #tpu.pipeline_mode<synchronous>, transform_indices = @transform_2, window_bounds = array<i64: 1, 32>}, {transform_indices = @transform_3, window_bounds = array<i64: 16, 32>}, {pipeline_mode = #tpu.pipeline_mode<synchronous>, transform_indices = @transform_4, window_bounds = array<i64: 1, 32>}, {pipeline_mode = #tpu.pipeline_mode<synchronous>, transform_indices = @transform_5, window_bounds = array<i64: 1, 32>}, {transform_indices = @transform_6, window_bounds = array<i64: 16, 32>}]} {
    %c0 = arith.constant 0 : index
    %c0_0 = arith.constant 0 : index
    %0 = vector.load %arg1[%c0, %c0_0] : memref<16x64xbf16, #tpu.memory_space<vmem>>, vector<16x64xbf16>
    %c0_1 = arith.constant 0 : index
    %c0_2 = arith.constant 0 : index
    %1 = vector.load %arg2[%c0_1, %c0_2] : memref<64x32xbf16, #tpu.memory_space<vmem>>, vector<64x32xbf16>
    %cst = arith.constant dense<0.000000e+00> : vector<16x32xf32>
    %2 = tpu.matmul %0, %1, %cst {dimension_numbers = #tpu.dot_dimension_numbers<[1], [0], [0], [1], [0, 0, 1, 1], [], []>} : vector<16x64xbf16>, vector<64x32xbf16>, vector<16x32xf32> -> vector<16x32xf32>
    %c0_3 = arith.constant 0 : index
    %c0_4 = arith.constant 0 : index
    %3 = vector.load %arg3[%c0_3, %c0_4] : memref<1x32xf32, #tpu.memory_space<vmem>>, vector<1x32xf32>
    %4 = vector.broadcast %3 : vector<1x32xf32> to vector<16x32xf32>
    %5 = arith.addf %2, %4 : vector<16x32xf32>
    %c0_5 = arith.constant 0 : index
    %c0_6 = arith.constant 0 : index
    %6 = vector.load %arg4[%c0_5, %c0_6] : memref<16x32xbf16, #tpu.memory_space<vmem>>, vector<16x32xbf16>
    %7 = arith.extf %6 : vector<16x32xbf16> to vector<16x32xf32>
    %8 = arith.addf %5, %7 : vector<16x32xf32>
    %cst_7 = arith.constant dense<0.000000e+00> : vector<16xf32>
    %9 = vector.multi_reduction <add>, %8, %cst_7 [1] : vector<16x32xf32> to vector<16xf32>
    %10 = vector.shape_cast %9 : vector<16xf32> to vector<16x1xf32>
    %cst_8 = arith.constant 3.200000e+01 : f32
    %11 = vector.broadcast %cst_8 : f32 to vector<16x1xf32>
    %12 = arith.divf %10, %11 : vector<16x1xf32>
    %13 = vector.broadcast %12 : vector<16x1xf32> to vector<16x32xf32>
    %14 = arith.subf %8, %13 : vector<16x32xf32>
    %15 = vector.broadcast %12 : vector<16x1xf32> to vector<16x32xf32>
    %16 = arith.subf %8, %15 : vector<16x32xf32>
    %17 = arith.mulf %14, %16 : vector<16x32xf32>
    %cst_9 = arith.constant dense<0.000000e+00> : vector<16xf32>
    %18 = vector.multi_reduction <add>, %17, %cst_9 [1] : vector<16x32xf32> to vector<16xf32>
    %19 = vector.shape_cast %18 : vector<16xf32> to vector<16x1xf32>
    %cst_10 = arith.constant 3.200000e+01 : f32
    %20 = vector.broadcast %cst_10 : f32 to vector<16x1xf32>
    %21 = arith.divf %19, %20 : vector<16x1xf32>
    %22 = vector.broadcast %12 : vector<16x1xf32> to vector<16x32xf32>
    %23 = arith.subf %8, %22 : vector<16x32xf32>
    %cst_11 = arith.constant 9.99999996E-13 : f32
    %24 = vector.broadcast %cst_11 : f32 to vector<16x1xf32>
    %25 = arith.addf %21, %24 : vector<16x1xf32>
    %26 = math.rsqrt %25 : vector<16x1xf32>
    %27 = vector.broadcast %26 : vector<16x1xf32> to vector<16x32xf32>
    %28 = arith.mulf %23, %27 : vector<16x32xf32>
    %c0_12 = arith.constant 0 : index
    %c0_13 = arith.constant 0 : index
    %29 = vector.load %arg5[%c0_12, %c0_13] : memref<1x32xf32, #tpu.memory_space<vmem>>, vector<1x32xf32>
    %30 = vector.broadcast %29 : vector<1x32xf32> to vector<16x32xf32>
    %31 = arith.mulf %28, %30 : vector<16x32xf32>
    %c0_14 = arith.constant 0 : index
    %c0_15 = arith.constant 0 : index
    %32 = vector.load %arg6[%c0_14, %c0_15] : memref<1x32xf32, #tpu.memory_space<vmem>>, vector<1x32xf32>
    %33 = vector.broadcast %32 : vector<1x32xf32> to vector<16x32xf32>
    %34 = arith.addf %31, %33 : vector<16x32xf32>
    %35 = arith.truncf %34 : vector<16x32xf32> to vector<16x32xbf16>
    %c0_16 = arith.constant 0 : index
    %c0_17 = arith.constant 0 : index
    %36 = vector.load %arg7[%c0_16, %c0_17] : memref<16x32xbf16, #tpu.memory_space<vmem>>, vector<16x32xbf16>
    tpu.vector_store %arg7[%c0_16, %c0_17], %35 {strides = array<i32>} : memref<16x32xbf16, #tpu.memory_space<vmem>>, vector<16x32xbf16>,
    return
  }
  func.func @transform_0(%arg0: i32) -> (i32, i32) {
    %c0_i32 = arith.constant 0 : i32
    %c0_i32_0 = arith.constant 0 : i32
    return %arg0, %c0_i32 : i32, i32
  }
  func.func @transform_1(%arg0: i32) -> (i32, i32) {
    %c0_i32 = arith.constant 0 : i32
    %c0_i32_0 = arith.constant 0 : i32
    %c0_i32_1 = arith.constant 0 : i32
    return %c0_i32, %c0_i32_0 : i32, i32
  }
  func.func @transform_2(%arg0: i32) -> (i32, i32) {
    %c0_i32 = arith.constant 0 : i32
    %c0_i32_0 = arith.constant 0 : i32
    %c0_i32_1 = arith.constant 0 : i32
    return %c0_i32, %c0_i32_0 : i32, i32
  }
  func.func @transform_3(%arg0: i32) -> (i32, i32) {
    %c0_i32 = arith.constant 0 : i32
    %c0_i32_0 = arith.constant 0 : i32
    return %arg0, %c0_i32 : i32, i32
  }
  func.func @transform_4(%arg0: i32) -> (i32, i32) {
    %c0_i32 = arith.constant 0 : i32
    %c0_i32_0 = arith.constant 0 : i32
    %c0_i32_1 = arith.constant 0 : i32
    return %c0_i32, %c0_i32_0 : i32, i32
  }
  func.func @transform_5(%arg0: i32) -> (i32, i32) {
    %c0_i32 = arith.constant 0 : i32
    %c0_i32_0 = arith.constant 0 : i32
    %c0_i32_1 = arith.constant 0 : i32
    return %c0_i32, %c0_i32_0 : i32, i32
  }
  func.func @transform_6(%arg0: i32) -> (i32, i32) {
    %c0_i32 = arith.constant 0 : i32
    %c0_i32_0 = arith.constant 0 : i32
    return %arg0, %c0_i32 : i32, i32
  }
}

module attributes {stable_mosaic.version = 11 : i64} {
  func.func @_pool_head_kernel(%arg0: i32, %arg1: memref<2x32xbf16, #tpu.memory_space<vmem>>, %arg2: memref<32x32xbf16, #tpu.memory_space<vmem>>, %arg3: memref<1x32xf32, #tpu.memory_space<vmem>>, %arg4: memref<32x3xbf16, #tpu.memory_space<vmem>>, %arg5: memref<1x3xf32, #tpu.memory_space<vmem>>, %arg6: memref<2x3xf32, #tpu.memory_space<vmem>>) attributes {dimension_semantics = [#tpu.dimension_semantics<arbitrary>], iteration_bounds = array<i64: 1>, scalar_prefetch = 0 : i64, scratch_operands = 0 : i64, tpu.core_type = #tpu.core_type<tc>, window_params = [{pipeline_mode = #tpu.pipeline_mode<synchronous>, transform_indices = @transform_0, window_bounds = array<i64: 2, 32>}, {pipeline_mode = #tpu.pipeline_mode<synchronous>, transform_indices = @transform_1, window_bounds = array<i64: 32, 32>}, {pipeline_mode = #tpu.pipeline_mode<synchronous>, transform_indices = @transform_2, window_bounds = array<i64: 1, 32>}, {pipeline_mode = #tpu.pipeline_mode<synchronous>, transform_indices = @transform_3, window_bounds = array<i64: 32, 3>}, {pipeline_mode = #tpu.pipeline_mode<synchronous>, transform_indices = @transform_4, window_bounds = array<i64: 1, 3>}, {pipeline_mode = #tpu.pipeline_mode<synchronous>, transform_indices = @transform_5, window_bounds = array<i64: 2, 3>}]} {
    %c0 = arith.constant 0 : index
    %c0_0 = arith.constant 0 : index
    %0 = vector.load %arg1[%c0, %c0_0] : memref<2x32xbf16, #tpu.memory_space<vmem>>, vector<2x32xbf16>
    %c0_1 = arith.constant 0 : index
    %c0_2 = arith.constant 0 : index
    %1 = vector.load %arg2[%c0_1, %c0_2] : memref<32x32xbf16, #tpu.memory_space<vmem>>, vector<32x32xbf16>
    %cst = arith.constant dense<0.000000e+00> : vector<2x32xf32>
    %2 = tpu.matmul %0, %1, %cst {dimension_numbers = #tpu.dot_dimension_numbers<[1], [0], [0], [1], [0, 0, 1, 1], [], []>} : vector<2x32xbf16>, vector<32x32xbf16>, vector<2x32xf32> -> vector<2x32xf32>
    %c0_3 = arith.constant 0 : index
    %c0_4 = arith.constant 0 : index
    %3 = vector.load %arg3[%c0_3, %c0_4] : memref<1x32xf32, #tpu.memory_space<vmem>>, vector<1x32xf32>
    %4 = vector.broadcast %3 : vector<1x32xf32> to vector<2x32xf32>
    %5 = arith.addf %2, %4 : vector<2x32xf32>
    %6 = math.tanh %5 : vector<2x32xf32>
    %7 = arith.truncf %6 : vector<2x32xf32> to vector<2x32xbf16>
    %c0_5 = arith.constant 0 : index
    %c0_6 = arith.constant 0 : index
    %8 = vector.load %arg4[%c0_5, %c0_6] : memref<32x3xbf16, #tpu.memory_space<vmem>>, vector<32x3xbf16>
    %cst_7 = arith.constant dense<0.000000e+00> : vector<2x3xf32>
    %9 = tpu.matmul %7, %8, %cst_7 {dimension_numbers = #tpu.dot_dimension_numbers<[1], [0], [0], [1], [0, 0, 1, 1], [], []>} : vector<2x32xbf16>, vector<32x3xbf16>, vector<2x3xf32> -> vector<2x3xf32>
    %c0_8 = arith.constant 0 : index
    %c0_9 = arith.constant 0 : index
    %10 = vector.load %arg5[%c0_8, %c0_9] : memref<1x3xf32, #tpu.memory_space<vmem>>, vector<1x3xf32>
    %11 = vector.broadcast %10 : vector<1x3xf32> to vector<2x3xf32>
    %12 = arith.addf %9, %11 : vector<2x3xf32>
    %c0_10 = arith.constant 0 : index
    %c0_11 = arith.constant 0 : index
    %13 = vector.load %arg6[%c0_10, %c0_11] : memref<2x3xf32, #tpu.memory_space<vmem>>, vector<2x3xf32>
    tpu.vector_store %arg6[%c0_10, %c0_11], %12 {strides = array<i32>} : memref<2x3xf32, #tpu.memory_space<vmem>>, vector<2x3xf32>,
    return
  }
  func.func @transform_0(%arg0: i32) -> (i32, i32) {
    %c0_i32 = arith.constant 0 : i32
    %c0_i32_0 = arith.constant 0 : i32
    %c0_i32_1 = arith.constant 0 : i32
    return %c0_i32, %c0_i32_0 : i32, i32
  }
  func.func @transform_1(%arg0: i32) -> (i32, i32) {
    %c0_i32 = arith.constant 0 : i32
    %c0_i32_0 = arith.constant 0 : i32
    %c0_i32_1 = arith.constant 0 : i32
    return %c0_i32, %c0_i32_0 : i32, i32
  }
  func.func @transform_2(%arg0: i32) -> (i32, i32) {
    %c0_i32 = arith.constant 0 : i32
    %c0_i32_0 = arith.constant 0 : i32
    %c0_i32_1 = arith.constant 0 : i32
    return %c0_i32, %c0_i32_0 : i32, i32
  }
  func.func @transform_3(%arg0: i32) -> (i32, i32) {
    %c0_i32 = arith.constant 0 : i32
    %c0_i32_0 = arith.constant 0 : i32
    %c0_i32_1 = arith.constant 0 : i32
    return %c0_i32, %c0_i32_0 : i32, i32
  }
  func.func @transform_4(%arg0: i32) -> (i32, i32) {
    %c0_i32 = arith.constant 0 : i32
    %c0_i32_0 = arith.constant 0 : i32
    %c0_i32_1 = arith.constant 0 : i32
    return %c0_i32, %c0_i32_0 : i32, i32
  }
  func.func @transform_5(%arg0: i32) -> (i32, i32) {
    %c0_i32 = arith.constant 0 : i32
    %c0_i32_0 = arith.constant 0 : i32
    %c0_i32_1 = arith.constant 0 : i32
    return %c0_i32, %c0_i32_0 : i32, i32
  }
}

</mosaic_0001>

<bundles_post_ra>
// kernel: sentiment_classifier_forward.12
= control target key start
LH: loop header
LB: loop body
LE: loop exit
PB: predicated region body
PF: predicated region fallthrough
CT: control target
= control target key end

     0   :  { %vm16_vm0 = vcmask 261120   ;;  %vm70_vm1 = vcmask 257024   ;;  %s129_s0 = inlined_call_operand.vmem [shape: f32[16,32], index: 0, kind: input, shape index: {}]   ;;  %s130_s1 = inlined_call_operand.vmem [shape: f32[1,32], index: 1, kind: input, shape index: {}]   ;;  %s131_s2 = inlined_call_operand.vmem [shape: f32[1,32], index: 2, kind: input, shape index: {}]   ;;  %s132_s3 = inlined_call_operand.vmem [shape: bf16[16,32], index: 3, kind: output, shape index: {}]  }
   0x1   :  { %v14_v0 = vld [vmem:[%s129_s0] sm:$0xff]  ;;  %v15_v1 = vld [vmem:[%s129_s0 + $0x8] sm:$0xff] }
   0x2   :  { %v17_v2 = vsel %vm16_vm0, %v14_v0, 0.0  ;;  %v20_v3 = vsel %vm16_vm0, %v15_v1, 0.0  ;;  %v77_v21 = vld [vmem:[%s130_s1] ss:$0 sm:$0xff] }
   0x3   :  { %18 = vadd.xlane.f32.xlu0 %v17_v2  ;;  %v78_v23 = vld [vmem:[%s131_s2] ss:$0 sm:$0xff] }
   0x7   :  { %21 = vadd.xlane.f32.xlu0 %v20_v3 }
  0x90   :  { %v19_v4 = vpop.xlane.xlu0 %18 }
  0x91   :  { %v24_v5 = vmul.f32 0.03125, %v19_v4 }
  0x93   :  { %v26_v6 = vsub.f32 %v14_v0, %v24_v5 }
  0x94   :  { %v22_v7 = vpop.xlane.xlu0 %21 }
  0x95   :  { %v25_v8 = vmul.f32 0.03125, %v22_v7  ;;  %v28_v9 = vmul.f32 %v26_v6, %v26_v6 }
  0x97   :  { %v27_v10 = vsub.f32 %v15_v1, %v25_v8  ;;  %v30_v11 = vsel %vm16_vm0, %v28_v9, 0.0 }
  0x98   :  { %31 = vadd.xlane.f32.xlu1 %v30_v11 }
  0x99   :  { %v29_v12 = vmul.f32 %v27_v10, %v27_v10 }
  0x9b   :  { %v33_v13 = vsel %vm16_vm0, %v29_v12, 0.0 }
  0x9c   :  { %34 = vadd.xlane.f32.xlu1 %v33_v13 }
 0x125   :  { %v32_v14 = vpop.xlane.xlu1 %31 }
 0x126   :  { %v36_v15 = vmul.f32 0.03125, %v32_v14 }
 0x128   :  { %v38_v16 = vadd.f32 1e-12, %v36_v15 }
 0x129   :  { %v35_v17 = vpop.xlane.xlu1 %34 }
 0x12a   :  { %83 = vrsqrt.f32 %v38_v16  ;;  %v37_v18 = vmul.f32 0.03125, %v35_v17 }
 0x12c   :  { %v39_v19 = vadd.f32 1e-12, %v37_v18 }
 0x12e   :  { %85 = vrsqrt.f32 %v39_v19 }
 0x134   :  { %v84_v20 = vpop.eup %83 }
 0x135   :  { %v42_v22 = vmul.f32 %v84_v20, %v26_v6 }
 0x137   :  { %v51_v24 = vmul.f32 %v77_v21, %v42_v22 }
 0x138   :  { %v86_v25 = vpop.eup %85 }
 0x139   :  { %v60_v26 = vadd.f32 %v78_v23, %v51_v24  ;;  %v43_v27 = vmul.f32 %v86_v25, %v27_v10 }
 0x13b   :  { %v81_v28 = vpack.c.bf16 %v60_v26, %v60_v26  ;;  %v52_v29 = vmul.f32 %v77_v21, %v43_v27 }
 0x13d   :  { %71 = vst.msk [vmem:[%s132_s3] sm:$0xf] %vm70_vm1, %v81_v28  ;;  %v61_v30 = vadd.f32 %v78_v23, %v52_v29 }
 0x13f   :  { %v82_v31 = vpack.c.bf16 %v61_v30, %v61_v30 }
 0x141   :  { %72 = vst.msk [vmem:[%s132_s3 + $0x4] sm:$0xf] %vm70_vm1, %v82_v31 }

// kernel: sentiment_classifier_forward.15
= control target key start
LH: loop header
LB: loop body
LE: loop exit
PB: predicated region body
PF: predicated region fallthrough
CT: control target
= control target key end

     0   :  { %v200_v0 = vmov 0.0   ;;  %vm201_vm0 = vmmov 0   ;;  %vm54_vm1 = vcmask 261120   ;;  %vm158_vm2 = vcmask 257024   ;;  %s269_s1 = inlined_call_operand.vmem [shape: bf16[32,32], index: 1, kind: input, shape index: {}]   ;;  %s270_s0 = inlined_call_operand.vmem [shape: bf16[16,32], index: 0, kind: input, shape index: {}]   ;;  %s271_s3 = inlined_call_operand.vmem [shape: bf16[16,32], index: 3, kind: input, shape index: {}]   ;;  %s272_s2 = inlined_call_operand.vmem [shape: f32[1,32], index: 2, kind: input, shape index: {}]   ;;  %s273_s4 = inlined_call_operand.vmem [shape: f32[1,32], index: 4, kind: input, shape index: {}]   ;;  %s274_s5 = inlined_call_operand.vmem [shape: f32[1,32], index: 5, kind: input, shape index: {}]   ;;  %s275_s6 = inlined_call_operand.vmem [shape: bf16[16,32], index: 6, kind: output, shape index: {}]  }
   0x1   :  { %183 = vmatprep.subr.bf16.mxu0 %v200_v0  ;;  %v193_v1 = vld [vmem:[%s269_s1] sm:$0xff]   ;;  %187 = vmatprep.mubr.msk.bf16.mxu0 %vm201_vm0, %v200_v0  ;;  %v194_v2 = vld [vmem:[%s269_s1 + $0x8] sm:$0xff]  }
   0x2   :  { %184 = vmatpush3.bf16.msra.mxu0 %v193_v1  ;;  %v195_v3 = vld [vmem:[%s270_s0] sm:$0xff]  }
   0x3   :  { %185 = vmatprep.subr.bf16.mxu0 %v200_v0  ;;  %v177_v4 = vld [vmem:[%s271_s3] sm:$0xff]  }
   0x4   :  { %v165_v5 = vld [vmem:[%s272_s2] ss:$0 sm:$0xff]  ;;  %v178_v6 = vunpack.c.l.bf16 %v177_v4  ;;  %v179_v10 = vunpack.c.h.bf16 %v177_v4 }
   0x5   :  { %v170_v35 = vld [vmem:[%s273_s4] ss:$0 sm:$0xff] }
   0x6   :  { %186 = vmatpush3.bf16.msra.mxu0 %v194_v2  ;;  %v171_v37 = vld [vmem:[%s274_s5] ss:$0 sm:$0xff] }
   0x9   :  { %188 = vmatmul.mubr.msk.bf16.vlgmr.msra.gmra.mrb[0].mxu0 %vm54_vm1, %v195_v3 }
  0xdc   :  { %v92_v7 = vpop.f32.mrb[0].mxu0 }
  0xdd   :  { %v93_v8 = vadd.f32 %v165_v5, %v92_v7  ;;  %v189_v9 = vpop.f32.mrb[1].mxu0 }
  0xde   :  { %v95_v11 = vpop.f32.mrb[2].mxu0 }
  0xdf   :  { %v96_v12 = vadd.f32 %v165_v5, %v95_v11  ;;  %v190_v13 = vpop.f32.mrb[3].mxu0  ;;  %v103_v14 = vadd.f32 %v178_v6, %v93_v8 }
  0xe1   :  { %v105_v15 = vsel %vm54_vm1, %v103_v14, 0.0  ;;  %v104_v16 = vadd.f32 %v179_v10, %v96_v12 }
  0xe2   :  { %106 = vadd.xlane.f32.xlu0 %v105_v15 }
  0xe3   :  { %v108_v17 = vsel %vm54_vm1, %v104_v16, 0.0 }
  0xe6   :  { %109 = vadd.xlane.f32.xlu0 %v108_v17 }
 0x16f   :  { %v107_v18 = vpop.xlane.xlu0 %106 }
 0x170   :  { %v112_v19 = vmul.f32 0.03125, %v107_v18 }
 0x172   :  { %v114_v20 = vsub.f32 %v103_v14, %v112_v19 }
 0x173   :  { %v110_v21 = vpop.xlane.xlu0 %109 }
 0x174   :  { %v113_v22 = vmul.f32 0.03125, %v110_v21  ;;  %v116_v23 = vmul.f32 %v114_v20, %v114_v20 }
 0x176   :  { %v115_v24 = vsub.f32 %v104_v16, %v113_v22  ;;  %v118_v25 = vsel %vm54_vm1, %v116_v23, 0.0 }
 0x177   :  { %119 = vadd.xlane.f32.xlu1 %v118_v25 }
 0x178   :  { %v117_v26 = vmul.f32 %v115_v24, %v115_v24 }
 0x17a   :  { %v121_v27 = vsel %vm54_vm1, %v117_v26, 0.0 }
 0x17b   :  { %122 = vadd.xlane.f32.xlu1 %v121_v27 }
 0x204   :  { %v120_v28 = vpop.xlane.xlu1 %119 }
 0x205   :  { %v124_v29 = vmul.f32 0.03125, %v120_v28 }
 0x207   :  { %v126_v30 = vadd.f32 1e-12, %v124_v29 }
 0x208   :  { %v123_v31 = vpop.xlane.xlu1 %122 }
 0x209   :  { %196 = vrsqrt.f32 %v126_v30  ;;  %v125_v32 = vmul.f32 0.03125, %v123_v31 }
 0x20b   :  { %v127_v33 = vadd.f32 1e-12, %v125_v32 }
 0x20d   :  { %198 = vrsqrt.f32 %v127_v33 }
 0x213   :  { %v197_v34 = vpop.eup %196 }
 0x214   :  { %v130_v36 = vmul.f32 %v197_v34, %v114_v20 }
 0x216   :  { %v139_v38 = vmul.f32 %v170_v35, %v130_v36 }
 0x217   :  { %v199_v39 = vpop.eup %198 }
 0x218   :  { %v148_v40 = vadd.f32 %v171_v37, %v139_v38  ;;  %v131_v41 = vmul.f32 %v199_v39, %v115_v24 }
 0x21a   :  { %v174_v42 = vpack.c.bf16 %v148_v40, %v148_v40  ;;  %v140_v43 = vmul.f32 %v170_v35, %v131_v41 }
 0x21c   :  { %159 = vst.msk [vmem:[%s275_s6] sm:$0xf] %vm158_vm2, %v174_v42  ;;  %v149_v44 = vadd.f32 %v171_v37, %v140_v43 }
 0x21e   :  { %v175_v45 = vpack.c.bf16 %v149_v44, %v149_v44 }
 0x220   :  { %160 = vst.msk [vmem:[%s275_s6 + $0x4] sm:$0xf] %vm158_vm2, %v175_v45 }

// kernel: sentiment_classifier_forward.13
= control target key start
LH: loop header
LB: loop body
LE: loop exit
PB: predicated region body
PF: predicated region fallthrough
CT: control target
= control target key end

     0   :  { %v130_v0 = vmov 0.0   ;;  %vm131_vm0 = vmmov 0   ;;  %vm45_vm1 = vcmask 261120   ;;  %vm98_vm2 = vcmask 781312   ;;  %s170_s1 = inlined_call_operand.vmem [shape: bf16[32,96], index: 1, kind: input, shape index: {}]   ;;  %s171_s0 = inlined_call_operand.vmem [shape: bf16[16,32], index: 0, kind: input, shape index: {}]   ;;  %s172_s2 = inlined_call_operand.vmem [shape: f32[1,96], index: 2, kind: input, shape index: {}]   ;;  %s173_s3 = inlined_call_operand.vmem [shape: bf16[16,96], index: 3, kind: output, shape index: {}]  }
   0x1   :  { %117 = vmatprep.subr.bf16.mxu0 %v130_v0  ;;  %v127_v1 = vld [vmem:[%s170_s1] sm:$0xff]   ;;  %121 = vmatprep.mubr.msk.bf16.mxu0 %vm131_vm0, %v130_v0  ;;  %v128_v2 = vld [vmem:[%s170_s1 + $0x8] sm:$0xff]  }
   0x2   :  { %118 = vmatpush3.bf16.msra.mxu0 %v127_v1  ;;  %v129_v3 = vld [vmem:[%s171_s0] sm:$0xff]  }
   0x3   :  { %119 = vmatprep.subr.bf16.mxu0 %v130_v0  ;;  %v105_v4 = vld [vmem:[%s172_s2] ss:$0 sm:$0xff] }
   0x6   :  { %120 = vmatpush3.bf16.msra.mxu0 %v128_v2 }
   0x9   :  { %122 = vmatmul.mubr.msk.bf16.vlgmr.msra.gmra.mrb[0].mxu0 %vm45_vm1, %v129_v3 }
  0xdc   :  { %v83_v5 = vpop.f32.mrb[0].mxu0 }
  0xdd   :  { %v84_v6 = vadd.f32 %v105_v4, %v83_v5  ;;  %v123_v7 = vpop.f32.mrb[1].mxu0 }
  0xde   :  { %v86_v8 = vpop.f32.mrb[2].mxu0 }
  0xdf   :  { %v112_v9 = vpack.c.bf16 %v84_v6, %v84_v6  ;;  %v87_v10 = vadd.f32 %v105_v4, %v86_v8  ;;  %v124_v11 = vpop.f32.mrb[3].mxu0 }
  0xe1   :  { %99 = vst.msk [vmem:[%s173_s3] sm:$0xf] %vm98_vm2, %v112_v9  ;;  %v113_v12 = vpack.c.bf16 %v87_v10, %v87_v10 }
  0xe3   :  { %100 = vst.msk [vmem:[%s173_s3 + $0x4] sm:$0xf] %vm98_vm2, %v113_v12 }

// kernel: sentiment_classifier_forward.14
= control target key start
LH: loop header
LB: loop body
LE: loop exit
PB: predicated region body
PF: predicated region fallthrough
CT: control target
= control target key end

     0   :  { %s642_s9 = smov 0   ;;  %s644_s10 = smov 0   ;;  %s709_s0 = inlined_call_operand.vmem [shape: bf16[2,8,96], index: 0, kind: input, shape index: {}]   ;;  %s710_s1 = inlined_call_operand.vmem [shape: f32[2,1,8], index: 1, kind: input, shape index: {}]   ;;  %s711_s2 = inlined_call_operand.vmem [shape: bf16[2,8,32], index: 2, kind: output, shape index: {}]  }
   0x1   :  { %s646_s11 = smov 0  }
   0x2 LB: > { %s24_s12 = sadd.s32 1, %s613_s10  ;;  %p509_p0 = scmp.ge.s32.totalorder %s617_s11, 1  ;;  %s617_s11 = sphi %s646_s11, %s12_s11   ;;  %s613_s10 = sphi %s644_s10, %s713_s10   ;;  %s609_s9 = sphi %s642_s9, %s712_s9  }
   0x3   : > { %p26_p1 = scmp.ge.s32.totalorder %s24_s12, 2  ;;  %p133_p2 = scmp.lt.s32.totalorder %s617_s11, 3 }
   0x5   : > { %s715_s12 = smov (%p26_p1, %s24_s12), 0  ;;  %p134_p3 = pnand %p509_p0, %p133_p2 }
   0x6   : > { %p159_p4 = scmp.lt.s32.totalorder (!%p134_p3), %s609_s9, 1  ;;  %v619_v0 = vmov (!%p134_p3), 0.0   ;;  %vm620_vm0 = vmmov (!%p134_p3), 0   ;;  %s621_s17 = smov (!%p134_p3), 96   ;;  %vm193_vm1 = vcmask (!%p134_p3), 130048   ;;  %vm240_vm2 = vcmask (!%p134_p3), 64512  }
   0x7   : > { %137 = sbr.rel (%p134_p3) target bundleno = 1540 (0x604), region = 28  ;;  %529 = vmatprep.subr.bf16.mxu0 (!%p134_p3), %v619_v0  ;;  %531 = vmatprep.mubr.msk.bf16.mxu0 (!%p134_p3), %vm620_vm0, %v619_v0  ;;  %s622_s18 = smov (!%p134_p3), 64   ;;  %vm258_vm3 = vcmask (!%p134_p3), 1043456   ;;  %vm421_vm4 = vcmask (!%p134_p3), 257024  }
   0x8   : > { %535 = vmatprep.subr.bf16.mxu1 (!%p134_p3), %v619_v0  ;;  %537 = vmatprep.mubr.msk.bf16.mxu1 (!%p134_p3), %vm620_vm0, %v619_v0  ;;  %s623_s22 = smov (!%p134_p3), 80   ;;  %s624_s23 = smov (!%p134_p3), 112  }
   0x9   : > { %s625_s24 = smov (!%p134_p3), 48   ;;  %s626_s25 = smov (!%p134_p3), 16  }
   0xe   : > { %s717_s9 = smov (!%p159_p4, %s609_s9), 1 }
   0xf   : > { %s510_s13 = sshll.u32 %s717_s9, 2  ;;  %s165_s21 = scalar_lea.vmem %s710_s1, %s717_s9 }
  0x10   : > { %s162_s16 = scalar_lea.vmem %s709_s0, %s510_s13  ;;  %v512_v5 = vld [vmem:[%s165_s21] ss:$0 sm:$0xff]  ;;  %s172_s28 = scalar_lea.vmem %s711_s2, %s510_s13 }
  0x11   : > { %v670_v1 = vld [vmem:[%s162_s16] ss:$0 sps:$4 sm:$0xff]  }
  0x12   : > { %191 = vrot.lane.b32.xlu0 %v670_v1, %s621_s17  ;;  %v180_v4 = vld [vmem:[%s162_s16] sm:$0xf]  ;;  %253 = vrot.lane.b32.xlu1 %v670_v1, %s622_s18 }
  0x13   : > { %v516_v19 = vcombine.low %v180_v4, %v180_v4 }
  0x84   : > { %v192_v2 = vpop.permute.xlu0 %191  ;;  %v254_v12 = vpop.permute.xlu1 %253 }
  0x85   : > { %v198_v3 = vsel %vm193_vm1, %v192_v2, 0  ;;  %v260_v13 = vsel %vm258_vm3, %v254_v12, 0 }
  0x86   : > { %530 = vmatpush3.bf16.xpose.msra.mxu0 %v198_v3  ;;  %536 = vmatpush3.bf16.msra.mxu1 %v260_v13 }
  0x87   : > { %547 = vmatprep.subr.bf16.mxu0 %v619_v0  ;;  %541 = vmatprep.subr.bf16.mxu1 %v619_v0 }
  0x8d   : > { %532 = vmatmul.mubr.msk.bf16.vlgmr.msra.gmra.mrb[0].mxu0 %vm193_vm1, %v180_v4 }
  0x8e   : > { %549 = vmatprep.mubr.msk.bf16.mxu0 %vm620_vm0, %v619_v0 }
 0x160   : > { %v234_v6 = vpop.f32.mrb[0].mxu0 }
 0x161   : > { %v235_v7 = vadd.f32 %v512_v5, %v234_v6  ;;  %v533_v8 = vpop.f32.mrb[1].mxu0 }
 0x162   : > { %v237_v9 = vpop.f32.mrb[2].mxu0 }
 0x163   : > { %v534_v10 = vpop.f32.mrb[3].mxu0  ;;  %v241_v11 = vsel %vm240_vm2, %v235_v7, -inf }
 0x164   : > { %242 = vmax.xlane.f32.xlu0 %v241_v11 }
 0x1f1   : > { %v243_v14 = vpop.xlane.xlu0 %242 }
 0x1f2   : > { %v244_v15 = vsub.f32 %v235_v7, %v243_v14 }
 0x1f4   : > { %v245_v16 = vmul.f32 1.442695, %v244_v15 }
 0x1f6   : > { %587 = vpow2.f32 %v245_v16 }
 0x200   : > { %v588_v17 = vpop.eup %587 }
 0x201   : > { %v247_v18 = vsel %vm240_vm2, %v588_v17, 0.0 }
 0x202   : > { %248 = vadd.xlane.f32.xlu1 %v247_v18 }
 0x213   : > { %307 = vrot.lane.b32.xlu1 %v670_v1, %s623_s22 }
 0x217   : > { %305 = vrot.lane.b32.xlu1 %v516_v19, %s624_s23 }
 0x28f   : > { %v249_v20 = vpop.xlane.xlu1 %248 }
 0x290   : > { %589 = vrcp.f32 %v249_v20 }
 0x293   : > { %v308_v22 = vpop.permute.xlu1 %307 }
 0x294   : > { %v313_v24 = vsel %vm193_vm1, %v308_v22, 0 }
 0x297   : > { %v306_v26 = vpop.permute.xlu1 %305 }
 0x29a   : > { %v590_v21 = vpop.eup %589 }
 0x29b   : > { %v251_v23 = vmul.f32 %v590_v21, %v588_v17 }
 0x29d   : > { %v252_v25 = vpack.c.bf16 %v251_v23, %v251_v23 }
 0x29f   : > { %538 = vmatmul.mubr.msk.bf16.vlgmr.msra.gmra.mrb[0].mxu1 %vm240_vm2, %v252_v25 }
 0x2a0   : > { %542 = vmatpush3.bf16.xpose.msra.mxu1 %v313_v24  ;;  %543 = vmatprep.mubr.msk.bf16.mxu1 %vm620_vm0, %v619_v0 }
 0x2a7   : > { %544 = vmatmul.mubr.msk.bf16.vlgmr.msra.gmra.mrb[4].mxu1 %vm193_vm1, %v306_v26 }
 0x372   : > { %v296_v27 = vpop.f32.mrb[0].mxu1 }
 0x373   : > { %v539_v28 = vpop.f32.mrb[1].mxu1 }
 0x374   : > { %v299_v29 = vpop.f32.mrb[2].mxu1 }
 0x375   : > { %v540_v30 = vpop.f32.mrb[3].mxu1 }
 0x37a   : > { %v349_v31 = vpop.f32.mrb[4].mxu1 }
 0x37b   : > { %v350_v32 = vadd.f32 %v512_v5, %v349_v31  ;;  %v545_v33 = vpop.f32.mrb[5].mxu1 }
 0x37c   : > { %v352_v34 = vpop.f32.mrb[6].mxu1 }
 0x37d   : > { %v546_v35 = vpop.f32.mrb[7].mxu1  ;;  %v355_v36 = vsel %vm240_vm2, %v350_v32, -inf }
 0x37e   : > { %356 = vmax.xlane.f32.xlu1 %v355_v36 }
 0x40b   : > { %v357_v37 = vpop.xlane.xlu1 %356 }
 0x40c   : > { %v358_v38 = vsub.f32 %v350_v32, %v357_v37 }
 0x40e   : > { %v359_v39 = vmul.f32 1.442695, %v358_v38 }
 0x410   : > { %591 = vpow2.f32 %v359_v39 }
 0x41a   : > { %v592_v40 = vpop.eup %591 }
 0x41b   : > { %v361_v41 = vsel %vm240_vm2, %v592_v40, 0.0 }
 0x41c   : > { %362 = vadd.xlane.f32.xlu0 %v361_v41 }
 0x432   : > { %367 = vrot.lane.b32.xlu0 %v670_v1, %s625_s24 }
 0x4a9   : > { %v363_v42 = vpop.xlane.xlu0 %362 }
 0x4aa   : > { %593 = vrcp.f32 %v363_v42 }
 0x4ad   : > { %v368_v43 = vpop.permute.xlu0 %367 }
 0x4ae   : > { %v373_v44 = vsel %vm258_vm3, %v368_v43, 0 }
 0x4af   : > { %548 = vmatpush3.bf16.msra.mxu0 %v373_v44 }
 0x4b4   : > { %v594_v45 = vpop.eup %593 }
 0x4b5   : > { %v365_v46 = vmul.f32 %v594_v45, %v592_v40 }
 0x4b7   : > { %v366_v47 = vpack.c.bf16 %v365_v46, %v365_v46 }
 0x4b9   : > { %550 = vmatmul.mubr.msk.bf16.vlgmr.msra.gmra.mrb[4].mxu0 %vm240_vm2, %v366_v47 }
 0x58c   : > { %v409_v48 = vpop.f32.mrb[4].mxu0 }
 0x58d   : > { %416 = vrot.lane.b32.xlu0 %v409_v48, %s626_s25  ;;  %v551_v49 = vpop.f32.mrb[5].mxu0 }
 0x58e   : > { %v412_v50 = vpop.f32.mrb[6].mxu0 }
 0x58f   : > { %v552_v51 = vpop.f32.mrb[7].mxu0 }
 0x5ff   : > { %v417_v52 = vpop.permute.xlu0 %416 }
 0x600   : > { %v419_v53 = vsel %vm193_vm1, %v296_v27, %v417_v52 }
 0x601   : > { %v420_v54 = vpack.c.bf16 %v419_v53, %v419_v53 }
 0x603   : > { %422 = vst.msk [vmem:[%s172_s28] sm:$0xf] %vm421_vm4, %v420_v54 }
 0x604 PF: > { %s12_s11 = sadd.s32 1, %s617_s11   ;;  %s712_s9 = smov %s613_s10 }
 0x605   : > { %p9_p5 = scmp.ge.s32.totalorder %s12_s11, 4   ;;  %s713_s10 = smov %s715_s12 }
 0x607   :  { %11 = sbr.rel (!%p9_p5) target bundleno = 2 (0x2), region = 62 }

// kernel: sentiment_classifier_forward.16
= control target key start
LH: loop header
LB: loop body
LE: loop exit
PB: predicated region body
PF: predicated region fallthrough
CT: control target
= control target key end

     0   :  { %v152_v0 = vmov 0.0   ;;  %vm153_vm0 = vmmov 0   ;;  %vm45_vm1 = vcmask 261120   ;;  %vm116_vm2 = vcmask 519168   ;;  %s192_s1 = inlined_call_operand.vmem [shape: bf16[32,64], index: 1, kind: input, shape index: {}]   ;;  %s193_s0 = inlined_call_operand.vmem [shape: bf16[16,32], index: 0, kind: input, shape index: {}]   ;;  %s194_s2 = inlined_call_operand.vmem [shape: f32[1,64], index: 2, kind: input, shape index: {}]   ;;  %s195_s3 = inlined_call_operand.vmem [shape: bf16[16,64], index: 3, kind: output, shape index: {}]  }
   0x1   :  { %135 = vmatprep.subr.bf16.mxu0 %v152_v0  ;;  %v145_v1 = vld [vmem:[%s192_s1] sm:$0xff]   ;;  %139 = vmatprep.mubr.msk.bf16.mxu0 %vm153_vm0, %v152_v0  ;;  %v146_v2 = vld [vmem:[%s192_s1 + $0x8] sm:$0xff]  }
   0x2   :  { %136 = vmatpush3.bf16.msra.mxu0 %v145_v1  ;;  %v147_v3 = vld [vmem:[%s193_s0] sm:$0xff]  }
   0x3   :  { %137 = vmatprep.subr.bf16.mxu0 %v152_v0  ;;  %v123_v4 = vld [vmem:[%s194_s2] ss:$0 sm:$0xff] }
   0x6   :  { %138 = vmatpush3.bf16.msra.mxu0 %v146_v2 }
   0x9   :  { %140 = vmatmul.mubr.msk.bf16.vlgmr.msra.gmra.mrb[0].mxu0 %vm45_vm1, %v147_v3 }
  0xdc   :  { %v83_v5 = vpop.f32.mrb[0].mxu0 }
  0xdd   :  { %v84_v6 = vadd.f32 %v123_v4, %v83_v5  ;;  %v141_v7 = vpop.f32.mrb[1].mxu0 }
  0xde   :  { %v86_v8 = vpop.f32.mrb[2].mxu0 }
  0xdf   :  { %v92_v9 = vmul.f32 0.044715, %v84_v6  ;;  %v87_v10 = vadd.f32 %v123_v4, %v86_v8  ;;  %v142_v11 = vpop.f32.mrb[3].mxu0  ;;  %v90_v22 = vmul.f32 0.5, %v84_v6 }
  0xe1   :  { %v94_v12 = vmul.f32 %v92_v9, %v84_v6  ;;  %v93_v13 = vmul.f32 0.044715, %v87_v10  ;;  %v91_v26 = vmul.f32 0.5, %v87_v10 }
  0xe3   :  { %v96_v14 = vmul.f32 %v94_v12, %v84_v6  ;;  %v95_v15 = vmul.f32 %v93_v13, %v87_v10 }
  0xe5   :  { %v98_v16 = vadd.f32 %v96_v14, %v84_v6  ;;  %v97_v17 = vmul.f32 %v95_v15, %v87_v10 }
  0xe7   :  { %v100_v18 = vmul.f32 0.7978846, %v98_v16  ;;  %v99_v19 = vadd.f32 %v97_v17, %v87_v10 }
  0xe9   :  { %148 = vtanh.f32 %v100_v18  ;;  %v101_v20 = vmul.f32 0.7978846, %v99_v19 }
  0xeb   :  { %150 = vtanh.f32 %v101_v20 }
  0xf3   :  { %v149_v21 = vpop.eup %148 }
  0xf4   :  { %v104_v23 = vadd.f32 1.0, %v149_v21 }
  0xf5   :  { %v151_v24 = vpop.eup %150 }
  0xf6   :  { %v106_v25 = vmul.f32 %v104_v23, %v90_v22  ;;  %v105_v27 = vadd.f32 1.0, %v151_v24 }
  0xf8   :  { %v130_v28 = vpack.c.bf16 %v106_v25, %v106_v25  ;;  %v107_v29 = vmul.f32 %v105_v27, %v91_v26 }
  0xfa   :  { %117 = vst.msk [vmem:[%s195_s3] sm:$0xf] %vm116_vm2, %v130_v28  ;;  %v131_v30 = vpack.c.bf16 %v107_v29, %v107_v29 }
  0xfc   :  { %118 = vst.msk [vmem:[%s195_s3 + $0x4] sm:$0xf] %vm116_vm2, %v131_v30 }

// kernel: sentiment_classifier_forward.17
= control target key start
LH: loop header
LB: loop body
LE: loop exit
PB: predicated region body
PF: predicated region fallthrough
CT: control target
= control target key end

     0   :  { %v227_v0 = vmov 0.0   ;;  %vm228_vm0 = vmmov 0   ;;  %vm70_vm1 = vcmask 523264   ;;  %vm121_vm2 = vcmask 261120   ;;  %s301_s1 = inlined_call_operand.vmem [shape: bf16[64,32], index: 1, kind: input, shape index: {}]   ;;  %s302_s0 = inlined_call_operand.vmem [shape: bf16[16,64], index: 0, kind: input, shape index: {}]   ;;  %s303_s3 = inlined_call_operand.vmem [shape: bf16[16,32], index: 3, kind: input, shape index: {}]   ;;  %s304_s2 = inlined_call_operand.vmem [shape: f32[1,32], index: 2, kind: input, shape index: {}]   ;;  %s305_s4 = inlined_call_operand.vmem [shape: f32[1,32], index: 4, kind: input, shape index: {}]   ;;  %s306_s5 = inlined_call_operand.vmem [shape: f32[1,32], index: 5, kind: input, shape index: {}]   ;;  %s307_s6 = inlined_call_operand.vmem [shape: bf16[16,32], index: 6, kind: output, shape index: {}]  }
   0x1   :  { %204 = vmatprep.subr.bf16.mxu0 %v227_v0  ;;  %v218_v1 = vld [vmem:[%s301_s1] sm:$0xff]   ;;  %212 = vmatprep.mubr.msk.bf16.mxu0 %vm228_vm0, %v227_v0  ;;  %v219_v2 = vld [vmem:[%s301_s1 + $0x8] sm:$0xff]   ;;  %v220_v3 = vld [vmem:[%s301_s1 + $0x10] sm:$0xff]   ;;  %vm175_vm3 = vcmask 257024  }
   0x2   :  { %205 = vmatpush3.bf16.msra.mxu0 %v218_v1  ;;  %v221_v4 = vld [vmem:[%s301_s1 + $0x18] sm:$0xff]   ;;  %v222_v5 = vld [vmem:[%s302_s0] sm:$0xff]  }
   0x3   :  { %206 = vmatprep.subr.bf16.mxu0 %v227_v0  ;;  %v196_v6 = vld [vmem:[%s303_s3] sm:$0xff]  }
   0x4   :  { %v182_v7 = vld [vmem:[%s304_s2] ss:$0 sm:$0xff]  ;;  %v197_v8 = vunpack.c.l.bf16 %v196_v6  ;;  %v198_v12 = vunpack.c.h.bf16 %v196_v6 }
   0x5   :  { %v189_v37 = vld [vmem:[%s305_s4] ss:$0 sm:$0xff] }
   0x6   :  { %207 = vmatpush3.bf16.msra.mxu0 %v219_v2  ;;  %v190_v39 = vld [vmem:[%s306_s5] ss:$0 sm:$0xff] }
   0x7   :  { %208 = vmatprep.subr.bf16.mxu0 %v227_v0 }
   0xa   :  { %209 = vmatpush3.bf16.msra.mxu0 %v220_v3 }
   0xb   :  { %210 = vmatprep.subr.bf16.mxu0 %v227_v0 }
   0xe   :  { %211 = vmatpush3.bf16.msra.mxu0 %v221_v4 }
  0x11   :  { %213 = vmatmul.mubr.msk.bf16.vlgmr.msra.gmra.mrb[0].mxu0 %vm70_vm1, %v222_v5 }
  0xe4   :  { %v108_v9 = vpop.f32.mrb[0].mxu0 }
  0xe5   :  { %v109_v10 = vadd.f32 %v182_v7, %v108_v9  ;;  %v214_v11 = vpop.f32.mrb[1].mxu0 }
  0xe6   :  { %v111_v13 = vpop.f32.mrb[2].mxu0 }
  0xe7   :  { %v112_v14 = vadd.f32 %v182_v7, %v111_v13  ;;  %v215_v15 = vpop.f32.mrb[3].mxu0  ;;  %v119_v16 = vadd.f32 %v197_v8, %v109_v10 }
  0xe9   :  { %v122_v17 = vsel %vm121_vm2, %v119_v16, 0.0  ;;  %v120_v18 = vadd.f32 %v198_v12, %v112_v14 }
  0xea   :  { %123 = vadd.xlane.f32.xlu0 %v122_v17 }
  0xeb   :  { %v125_v19 = vsel %vm121_vm2, %v120_v18, 0.0 }
  0xee   :  { %126 = vadd.xlane.f32.xlu0 %v125_v19 }
 0x177   :  { %v124_v20 = vpop.xlane.xlu0 %123 }
 0x178   :  { %v129_v21 = vmul.f32 0.03125, %v124_v20 }
 0x17a   :  { %v131_v22 = vsub.f32 %v119_v16, %v129_v21 }
 0x17b   :  { %v127_v23 = vpop.xlane.xlu0 %126 }
 0x17c   :  { %v130_v24 = vmul.f32 0.03125, %v127_v23  ;;  %v133_v25 = vmul.f32 %v131_v22, %v131_v22 }
 0x17e   :  { %v132_v26 = vsub.f32 %v120_v18, %v130_v24  ;;  %v135_v27 = vsel %vm121_vm2, %v133_v25, 0.0 }
 0x17f   :  { %136 = vadd.xlane.f32.xlu1 %v135_v27 }
 0x180   :  { %v134_v28 = vmul.f32 %v132_v26, %v132_v26 }
 0x182   :  { %v138_v29 = vsel %vm121_vm2, %v134_v28, 0.0 }
 0x183   :  { %139 = vadd.xlane.f32.xlu1 %v138_v29 }
 0x20c   :  { %v137_v30 = vpop.xlane.xlu1 %136 }
 0x20d   :  { %v141_v31 = vmul.f32 0.03125, %v137_v30 }
 0x20f   :  { %v143_v32 = vadd.f32 1e-12, %v141_v31 }
 0x210   :  { %v140_v33 = vpop.xlane.xlu1 %139 }
 0x211   :  { %223 = vrsqrt.f32 %v143_v32  ;;  %v142_v34 = vmul.f32 0.03125, %v140_v33 }
 0x213   :  { %v144_v35 = vadd.f32 1e-12, %v142_v34 }
 0x215   :  { %225 = vrsqrt.f32 %v144_v35 }
 0x21b   :  { %v224_v36 = vpop.eup %223 }
 0x21c   :  { %v147_v38 = vmul.f32 %v224_v36, %v131_v22 }
 0x21e   :  { %v156_v40 = vmul.f32 %v189_v37, %v147_v38 }
 0x21f   :  { %v226_v41 = vpop.eup %225 }
 0x220   :  { %v165_v42 = vadd.f32 %v190_v39, %v156_v40  ;;  %v148_v43 = vmul.f32 %v226_v41, %v132_v26 }
 0x222   :  { %v193_v44 = vpack.c.bf16 %v165_v42, %v165_v42  ;;  %v157_v45 = vmul.f32 %v189_v37, %v148_v43 }
 0x224   :  { %176 = vst.msk [vmem:[%s307_s6] sm:$0xf] %vm175_vm3, %v193_v44  ;;  %v166_v46 = vadd.f32 %v190_v39, %v157_v45 }
 0x226   :  { %v194_v47 = vpack.c.bf16 %v166_v46, %v166_v46 }
 0x228   :  { %177 = vst.msk [vmem:[%s307_s6 + $0x4] sm:$0xf] %vm175_vm3, %v194_v47 }

// kernel: sentiment_classifier_forward.23
= control target key start
LH: loop header
LB: loop body
LE: loop exit
PB: predicated region body
PF: predicated region fallthrough
CT: control target
= control target key end

     0   :  { %v237_v1 = vmov 0.0   ;;  %vm238_vm0 = vmmov 0   ;;  %s305_s0 = inlined_call_operand.vmem [shape: bf16[2,32], index: 0, kind: input, shape index: {}]   ;;  %s306_s1 = inlined_call_operand.vmem [shape: bf16[32,32], index: 1, kind: input, shape index: {}]   ;;  %s307_s2 = inlined_call_operand.vmem [shape: f32[1,32], index: 2, kind: input, shape index: {}]   ;;  %s308_s3 = inlined_call_operand.vmem [shape: bf16[32,3], index: 3, kind: input, shape index: {}]   ;;  %s309_s4 = inlined_call_operand.vmem [shape: f32[1,3], index: 4, kind: input, shape index: {}]   ;;  %s310_s5 = inlined_call_operand.hbm [shape: f32[2,3], index: 5, kind: output, shape index: {}]  }
   0x1   :  { %v207_v0 = vld [vmem:[%s306_s1] sm:$0xff]   ;;  %188 = vmatprep.subr.bf16.mxu0 %v237_v1  ;;  %196 = vmatprep.subr.bf16.mxu1 %v237_v1  ;;  %v208_v2 = vld [vmem:[%s306_s1 + $0x8] sm:$0xff]  }
   0x2   :  { %189 = vmatpush3.bf16.msra.mxu0 %v207_v0  ;;  %192 = vmatprep.mubr.msk.bf16.mxu0 %vm238_vm0, %v237_v1 }
   0x3   :  { %190 = vmatprep.subr.bf16.mxu0 %v237_v1  ;;  %200 = vmatprep.mubr.msk.bf16.mxu1 %vm238_vm0, %v237_v1 }
   0x4   :  { %10 = vsyncpa [#allocation3], 0  ;;  %v22_v3 = vld [vmem:[%s305_s0] sm:$0x1]  ;;  %vm46_vm1 = vcmask 261120   ;;  %v210_v5 = vld [vmem:[%s308_s3 + $0x8] sm:$0xff]  }
   0x5   :  { %v209_v4 = vld [vmem:[%s308_s3] sm:$0xff]   ;;  %s239_s3 = smov [#allocation2]   ;;  %vm158_vm2 = vcmask 17408  }
   0x6   :  { %191 = vmatpush3.bf16.msra.mxu0 %v208_v2  ;;  %197 = vmatpush3.bf16.msra.mxu1 %v209_v4  ;;  %v174_v6 = vld [vmem:[%s307_s2] ss:$0 sm:$0xff]  ;;  %s166_s30 = sshll.u32 %s239_s3, 4  ;;  %s167_s30 = int_to_ptr.vmem [resolvable:$true] %s166_s30 }
   0x7   :  { %198 = vmatprep.subr.bf16.mxu1 %v237_v1  ;;  %v178_v14 = vld [vmem:[%s309_s4] ss:$0 sm:$0xff]  ;;  %s213_s2 = scalar_lea.vmem %s167_s30, 32  ;;  %p218_p1 = scmp.lt.s32.totalorder %s167_s30, %s167_s30 }
   0x8   :  { %p214_p0 = scmp.ne.s32.totalorder %s167_s30, %s213_s2  ;;  %p219_p2 = scmp.lt.s32.totalorder %s213_s2, %s213_s2 }
   0x9   :  { %193 = vmatmul.mubr.msk.bf16.vlgmr.msra.gmra.mrb[0].mxu0 %vm46_vm1, %v22_v3 }
   0xa   :  { %199 = vmatpush3.bf16.msra.mxu1 %v210_v5  ;;  %p220_p3 = por %p219_p2, %p218_p1 }
   0xc   :  { %p221_p4 = pnand %p220_p3, %p214_p0 }
  0xdc   :  { %v84_v7 = vpop.f32.mrb[0].mxu0 }
  0xdd   :  { %v85_v8 = vadd.f32 %v174_v6, %v84_v7  ;;  %v194_v9 = vpop.f32.mrb[1].mxu0 }
  0xde   :  { %v87_v10 = vpop.f32.mrb[2].mxu0 }
  0xdf   :  { %211 = vtanh.f32 %v85_v8  ;;  %v195_v11 = vpop.f32.mrb[3].mxu0 }
  0xe9   :  { %v212_v12 = vpop.eup %211 }
  0xea   :  { %v91_v13 = vpack.c.bf16 %v212_v12, %v212_v12 }
  0xec   :  { %201 = vmatmul.mubr.msk.bf16.vlgmr.msra.gmra.mrb[0].mxu1 %vm46_vm1, %v91_v13 }
 0x1bf   :  { %v152_v15 = vpop.f32.mrb[0].mxu1 }
 0x1c0   :  { %v153_v16 = vadd.f32 %v178_v14, %v152_v15  ;;  %v202_v17 = vpop.f32.mrb[1].mxu1 }
 0x1c1   :  { %v155_v18 = vpop.f32.mrb[2].mxu1 }
 0x1c2   :  { %v203_v19 = vpop.f32.mrb[3].mxu1  ;;  %159 = vst.msk [vmem:[#allocation2] sm:$0x3] %vm158_vm2, %v153_v16 }
 0x1c3   :  { %224 = shalt.err (!%p221_p4)
}
 0x1c4   :  { %s225_s4 = scalar_lea.hbm %s310_s5, 32 }
 0x1c5   :  { %p226_p5 = scmp.ne.s32.totalorder %s310_s5, %s225_s4  ;;  %p229_p6 = scmp.lt.u32.totalorder %s225_s4, %s310_s5 }
 0x1c7   :  { %p231_p7 = pnand %p229_p6, %p226_p5 }
 0x1c9   :  { %234 = shalt.err (!%p231_p7)
}
 0x1ca   :  { %169 = dma.vmem_to_hbm [thread:$0]  %s167_s30, 32, %s310_s5, [#allocation3]  }
 0x1cb   :  { %235 = dma.done.wait [#allocation3], 32  }
 0x1cc   :  { %236 = vsyncadd [#allocation3], 4294967264 }
 0x1cd   :  { %173 = vsyncpa [#allocation3], 1 }

</bundles_post_ra>
